<compile_context>
chip_gen: v5e
topology: v5e:2x2
jax: 0.10.0
libtpu: 0.0.40
codegen_flags: <defaults>
</compile_context>

<pallas_src>
import functools

import jax
import jax.numpy as jnp
from jax import lax
from jax.experimental import pallas as pl
from jax.experimental.pallas import tpu as pltpu


def _vmem_limit_bytes():
    """Generation-aware scoped-VMEM limit (48 MiB on v7x, ~96 MiB on v5e/v6e)."""
    cap = 64 * 1024 * 1024
    try:
        cap = int(getattr(pltpu.get_tpu_info(), "vmem_capacity_bytes", cap))
    except Exception:
        pass
    return int(min(cap * 3 // 4, 100 * 1024 * 1024))


def _tile(n, prefer):
    """Largest t <= prefer with n % t == 0 and t a multiple of 128 (falls back
    to the full extent when n itself is not 128-aligned)."""
    if n % 128 != 0:
        return n
    t = min(prefer, n)
    t -= t % 128
    while n % t != 0:
        t -= 128
    return t


def _recip(v):
    # EUP approx reciprocal (separate issue slot) + one Newton step -> ~f32 acc.
    r = pl.reciprocal(v, approx=True)
    return r * (2.0 - v * r)


# ----------------------- fused attention kernel ------------------------------
# grid = (B, nq); B "parallel", q "arbitrary".
#   inputs : x (1,C,N resident per b), x q-tile (1,C,tq), rel (1,tq,N) bf16,
#            wqk (C4,C), wv (C,C), bv (C,1), wt (C,C), bt (C,1)
#   outputs: t = trans_conv(x - x_r)            (1,C,N, written at last q step)
#            stats = per-batch [mean, M2] of t  (1,C,2)
#   scratch: xk keys (C4,N), x_r accumulator (C,N) f32, attn column sums (1,N)
def _attn_kernel(x_ref, xq_ref, rel_ref, wqk_ref, wv_ref, bv_ref, wt_ref,
                 bt_ref, t_ref, stat_ref, xk_sc, xr_sc, colsum_sc, *,
                 compute_dtype):
    qi = pl.program_id(1)
    nq = pl.num_programs(1)
    cd = compute_dtype

    @pl.when(qi == 0)
    def _init():
        x_b = x_ref[0].astype(cd)                                    # (C, N)
        xk_sc[...] = jnp.dot(wqk_ref[...].astype(cd), x_b,
                             preferred_element_type=jnp.float32
                             ).astype(xk_sc.dtype)                   # keys (C4,N)
        xr_sc[...] = jnp.zeros_like(xr_sc)
        colsum_sc[...] = jnp.zeros_like(colsum_sc)

    # Per-q-tile projections (no dynamic lane slicing of the key scratch).
    x_q = xq_ref[0].astype(cd)                                       # (C, tq)
    xq = jnp.dot(wqk_ref[...].astype(cd), x_q,
                 preferred_element_type=jnp.float32)                 # (C4, tq)
    xv_q = (jnp.dot(wv_ref[...].astype(cd), x_q,
                    preferred_element_type=jnp.float32)
            + bv_ref[...].astype(jnp.float32))                       # (C, tq)

    # energy rows: contract the channel axis of both operands (q/k weights are
    # tied) -> no XLU transpose.  f32 accumulation; bf16 rel upcast at the add.
    e = lax.dot_general(xq.astype(cd), xk_sc[...],
                        (((0,), (0,)), ((), ())),
                        preferred_element_type=jnp.float32)          # (tq, N)
    e = e + rel_ref[0].astype(jnp.float32)
    e = e - jnp.max(e, axis=-1, keepdims=True)
    p = jnp.exp(e)
    attn = p * _recip(jnp.sum(p, axis=-1, keepdims=True))            # softmax(-1)

    # Column renorm commutes with xv@attn -> accumulate, renorm once at the end.
    colsum_sc[...] += jnp.sum(attn, axis=0, keepdims=True)           # (1, N)
    xr_sc[...] += jnp.dot(xv_q.astype(cd), attn.astype(cd),
                          preferred_element_type=jnp.float32)        # (C, N)

    @pl.when(qi == nq - 1)
    def _finalize():
        x_r = xr_sc[...] * _recip(1e-9 + colsum_sc[...])
        d = x_ref[0].astype(jnp.float32) - x_r                       # (C, N)
        t = (jnp.dot(wt_ref[...].astype(cd), d.astype(cd),
                     preferred_element_type=jnp.float32)
             + bt_ref[...].astype(jnp.float32))
        t_ref[0] = t.astype(t_ref.dtype)
        # Per-batch (mean, centered M2) partials -> Chan combine in the wrapper.
        inv_n = 1.0 / t.shape[1]
        mb = jnp.sum(t, axis=1, keepdims=True) * inv_n               # (C, 1)
        m2 = jnp.sum((t - mb) ** 2, axis=1, keepdims=True)           # (C, 1)
        stat_ref[0] = jnp.concatenate([mb, m2], axis=1).astype(stat_ref.dtype)


# ----------------------- BN apply + ReLU + residual --------------------------
def _bn_apply_kernel(x_ref, t_ref, scale_ref, shift_ref, out_ref):
    y = t_ref[...].astype(jnp.float32) * scale_ref[...] + shift_ref[...]
    out_ref[...] = (x_ref[...] + jnp.maximum(y, 0.0)).astype(out_ref.dtype)


def sa_layer_forward(x, rel_pos, params, *, compute_dtype=jnp.float32,
                     rel_dtype=jnp.bfloat16, q_tile=256, n_tile=4096):
    B, C, N = x.shape
    C4 = C // 4
    tq = _tile(N, q_tile)          # query-row tile for the attention kernel
    nq = N // tq
    tn = _tile(N, n_tile)          # lane tile for the BN-apply kernel

    wqk = params["wqk"]; wv = params["wv"]; bv = params["bv"]
    wt = params["wt"]; bt = params["bt"]
    gamma = params["gamma"]; beta = params["beta"]

    vmem = _vmem_limit_bytes()

    def cp(sem):
        return pltpu.CompilerParams(dimension_semantics=sem,
                                    vmem_limit_bytes=vmem)

    # rel_pos is the HBM-bound input: ship it bf16, upcast in-kernel.
    rel_in = rel_pos.astype(rel_dtype)
    rel_kwargs = {}
    if nq >= 3:
        # v5e-oriented: deeper rel prefetch keeps the DMA engine ahead of compute.
        rel_kwargs["pipeline_mode"] = pl.Buffered(3)
    rel_spec = pl.BlockSpec((1, tq, N), lambda b, q: (b, q, 0), **rel_kwargs)

    # --- fused projections + attention + trans_conv + BN partials -------------
    t_mid, stats = pl.pallas_call(
        functools.partial(_attn_kernel, compute_dtype=compute_dtype),
        out_shape=(jax.ShapeDtypeStruct((B, C, N), compute_dtype),
                   jax.ShapeDtypeStruct((B, C, 2), jnp.float32)),
        grid_spec=pltpu.PrefetchScalarGridSpec(
            num_scalar_prefetch=0,
            grid=(B, nq),
            in_specs=[
                pl.BlockSpec((1, C, N), lambda b, q: (b, 0, 0)),   # x, resident/b
                pl.BlockSpec((1, C, tq), lambda b, q: (b, 0, q)),  # x, q-tile view
                rel_spec,                                          # rel_pos (bf16)
                pl.BlockSpec((C4, C), lambda b, q: (0, 0)),        # wqk (tied q/k)
                pl.BlockSpec((C, C), lambda b, q: (0, 0)),         # wv
                pl.BlockSpec((C, 1), lambda b, q: (0, 0)),         # bv
                pl.BlockSpec((C, C), lambda b, q: (0, 0)),         # wt
                pl.BlockSpec((C, 1), lambda b, q: (0, 0)),         # bt
            ],
            out_specs=[
                pl.BlockSpec((1, C, N), lambda b, q: (b, 0, 0)),
                pl.BlockSpec((1, C, 2), lambda b, q: (b, 0, 0)),
            ],
            scratch_shapes=[
                pltpu.VMEM((C4, N), compute_dtype),   # key projection
                pltpu.VMEM((C, N), jnp.float32),      # x_r accumulator
                pltpu.VMEM((1, N), jnp.float32),      # attention column sums
            ]),
        compiler_params=cp(("parallel", "arbitrary")),
    )(x, x, rel_in, wqk, wv, bv, wt, bt)

    # Train-mode BatchNorm1d stats: Chan's parallel combine of per-batch
    # (mean, M2) partials.  C-sized XLA glue, negligible traffic.
    mean_b = stats[:, :, 0]                                          # (B, C)
    m2_b = stats[:, :, 1]                                            # (B, C)
    mean_c = jnp.mean(mean_b, axis=0)                                # (C,)
    var_c = (jnp.sum(m2_b, axis=0)
             + N * jnp.sum((mean_b - mean_c[None, :]) ** 2, axis=0)) / (B * N)
    inv = lax.rsqrt(var_c + 1e-5)
    g = gamma.reshape(-1)
    scale = (g * inv).reshape(C, 1)
    shift = (beta.reshape(-1) - mean_c * g * inv).reshape(C, 1)

    # --- normalize + ReLU + residual, directly in (B, C, N) -------------------
    out = pl.pallas_call(
        _bn_apply_kernel,
        out_shape=jax.ShapeDtypeStruct((B, C, N), x.dtype),
        grid_spec=pltpu.PrefetchScalarGridSpec(
            num_scalar_prefetch=0,
            grid=(B, N // tn),
            in_specs=[
                pl.BlockSpec((1, C, tn), lambda b, i: (b, 0, i)),
                pl.BlockSpec((1, C, tn), lambda b, i: (b, 0, i)),
                pl.BlockSpec((C, 1), lambda b, i: (0, 0)),
                pl.BlockSpec((C, 1), lambda b, i: (0, 0)),
            ],
            out_specs=pl.BlockSpec((1, C, tn), lambda b, i: (b, 0, i))),
        compiler_params=cp(("parallel", "parallel")),
    )(x, t_mid, scale, shift)

    return out


def _reference(x, rel_pos, p):
    """Pure-JAX reference of the PyTorch forward (training-mode BN)."""
    xk = jnp.einsum('oc,bcn->bon', p["wqk"], x)
    xq = jnp.swapaxes(xk, 1, 2)
    energy = jnp.einsum('bnc,bcm->bnm', xq, xk)
    attn = jax.nn.softmax(energy + rel_pos, axis=-1)
    attn = attn / (1e-9 + attn.sum(axis=1, keepdims=True))
    xv = jnp.einsum('oc,bcn->bon', p["wv"], x) + p["bv"][None]
    x_r = jnp.einsum('bcn,bnm->bcm', xv, attn)
    t = jnp.einsum('oc,bcn->bon', p["wt"], x - x_r) + p["bt"][None]
    mean = t.mean(axis=(0, 2), keepdims=True)
    var = ((t - mean) ** 2).mean(axis=(0, 2), keepdims=True)
    y = (t - mean) / jnp.sqrt(var + 1e-5)
    y = y * p["gamma"].reshape(1, -1, 1) + p["beta"].reshape(1, -1, 1)
    return x + jnp.maximum(y, 0.0)


def _init_params(key, channels):
    C = channels
    C4 = C // 4
    k1, k2, k3, k4, k5 = jax.random.split(key, 5)
    scale = 0.1
    return {
        "wqk": scale * jax.random.normal(k1, (C4, C), jnp.float32),  # tied q/k
        "wv": scale * jax.random.normal(k2, (C, C), jnp.float32),
        "bv": scale * jax.random.normal(k3, (C, 1), jnp.float32),
        "wt": scale * jax.random.normal(k4, (C, C), jnp.float32),
        "bt": scale * jax.random.normal(k5, (C, 1), jnp.float32),
        "gamma": jnp.ones((C, 1), jnp.float32),                      # BN defaults
        "beta": jnp.zeros((C, 1), jnp.float32),
    }


if __name__ == "__main__":
    # N=256 with q_tile=128 -> 2 q-tiles, exercising the accumulator/renorm path.
    B, C, N = 2, 32, 256
    key = jax.random.PRNGKey(0)
    kx, kr, kp = jax.random.split(key, 3)
    x = jax.random.normal(kx, (B, C, N), jnp.float32)
    rel_pos = jax.random.normal(kr, (B, N, N), jnp.float32)
    params = _init_params(kp, C)

    fwd = jax.jit(lambda xx, rr, pp: sa_layer_forward(xx, rr, pp, q_tile=128))
    out = jax.block_until_ready(fwd(x, rel_pos, params))
    assert out.shape == (B, C, N)

    # rel_pos is deliberately shipped bf16 (HBM-traffic optimization); compare
    # against the reference fed the identically-quantized rel so the check
    # isolates the kernel math (which accumulates everything in f32).
    rel_q = rel_pos.astype(jnp.bfloat16).astype(jnp.float32)
    ref = _reference(x, rel_q, params)
    assert bool(jnp.allclose(out, ref, atol=2e-4, rtol=2e-4))
    print("KERNEL_OK")
</pallas_src>

<mosaic_0001>
module attributes {stable_mosaic.version = 11 : i64} {
  func.func @_attn_kernel(%arg0: i32, %arg1: i32, %arg2: memref<1x32x256xf32, #tpu.memory_space<vmem>>, %arg3: memref<1x32x128xf32, #tpu.memory_space<vmem>>, %arg4: memref<1x128x256xbf16, #tpu.memory_space<vmem>>, %arg5: memref<8x32xf32, #tpu.memory_space<vmem>>, %arg6: memref<32x32xf32, #tpu.memory_space<vmem>>, %arg7: memref<32x1xf32, #tpu.memory_space<vmem>>, %arg8: memref<32x32xf32, #tpu.memory_space<vmem>>, %arg9: memref<32x1xf32, #tpu.memory_space<vmem>>, %arg10: memref<1x32x256xf32, #tpu.memory_space<vmem>>, %arg11: memref<1x32x2xf32, #tpu.memory_space<vmem>>, %arg12: memref<8x256xf32, #tpu.memory_space<vmem>>, %arg13: memref<32x256xf32, #tpu.memory_space<vmem>>, %arg14: memref<1x256xf32, #tpu.memory_space<vmem>>) attributes {dimension_semantics = [#tpu.dimension_semantics<parallel>, #tpu.dimension_semantics<arbitrary>], iteration_bounds = array<i64: 2, 2>, scalar_prefetch = 0 : i64, scratch_operands = 3 : i64, tpu.core_type = #tpu.core_type<tc>, window_params = [{transform_indices = @transform_0, window_bounds = array<i64: 1, 32, 256>}, {transform_indices = @transform_1, window_bounds = array<i64: 1, 32, 128>}, {transform_indices = @transform_2, window_bounds = array<i64: 1, 128, 256>}, {pipeline_mode = #tpu.pipeline_mode<synchronous>, transform_indices = @transform_3, window_bounds = array<i64: 8, 32>}, {pipeline_mode = #tpu.pipeline_mode<synchronous>, transform_indices = @transform_4, window_bounds = array<i64: 32, 32>}, {pipeline_mode = #tpu.pipeline_mode<synchronous>, transform_indices = @transform_5, window_bounds = array<i64: 32, 1>}, {pipeline_mode = #tpu.pipeline_mode<synchronous>, transform_indices = @transform_6, window_bounds = array<i64: 32, 32>}, {pipeline_mode = #tpu.pipeline_mode<synchronous>, transform_indices = @transform_7, window_bounds = array<i64: 32, 1>}, {transform_indices = @transform_8, window_bounds = array<i64: 1, 32, 256>}, {transform_indices = @transform_9, window_bounds = array<i64: 1, 32, 2>}]} {
    %c0_i32 = arith.constant 0 : i32
    %0 = arith.cmpi eq, %arg1, %c0_i32 : i32
    %1 = arith.extui %0 : i1 to i32
    %c0_i32_0 = arith.constant 0 : i32
    %2 = arith.cmpi ne, %1, %c0_i32_0 : i32
    scf.if %2 {
      %c0_30 = arith.constant 0 : index
      %c0_31 = arith.constant 0 : index
      %c0_32 = arith.constant 0 : index
      %44 = vector.load %arg2[%c0_30, %c0_31, %c0_32] : memref<1x32x256xf32, #tpu.memory_space<vmem>>, vector<1x32x256xf32>
      %45 = vector.shape_cast %44 : vector<1x32x256xf32> to vector<32x256xf32>
      %c0_33 = arith.constant 0 : index
      %c0_34 = arith.constant 0 : index
      %46 = vector.load %arg5[%c0_33, %c0_34] : memref<8x32xf32, #tpu.memory_space<vmem>>, vector<8x32xf32>
      %cst_35 = arith.constant dense<0.000000e+00> : vector<8x256xf32>
      %47 = tpu.matmul %46, %45, %cst_35 {dimension_numbers = #tpu.dot_dimension_numbers<[1], [0], [0], [1], [0, 0, 1, 1], [], []>} : vector<8x32xf32>, vector<32x256xf32>, vector<8x256xf32> -> vector<8x256xf32>
      %c0_36 = arith.constant 0 : index
      %c0_37 = arith.constant 0 : index
      %48 = vector.load %arg12[%c0_36, %c0_37] : memref<8x256xf32, #tpu.memory_space<vmem>>, vector<8x256xf32>
      tpu.vector_store %arg12[%c0_36, %c0_37], %47 {strides = array<i32>} : memref<8x256xf32, #tpu.memory_space<vmem>>, vector<8x256xf32>,
      %cst_38 = arith.constant 0.000000e+00 : f32
      %49 = vector.broadcast %cst_38 : f32 to vector<32x256xf32>
      %c0_39 = arith.constant 0 : index
      %c0_40 = arith.constant 0 : index
      %50 = vector.load %arg13[%c0_39, %c0_40] : memref<32x256xf32, #tpu.memory_space<vmem>>, vector<32x256xf32>
      tpu.vector_store %arg13[%c0_39, %c0_40], %49 {strides = array<i32>} : memref<32x256xf32, #tpu.memory_space<vmem>>, vector<32x256xf32>,
      %cst_41 = arith.constant 0.000000e+00 : f32
      %51 = vector.broadcast %cst_41 : f32 to vector<1x256xf32>
      %c0_42 = arith.constant 0 : index
      %c0_43 = arith.constant 0 : index
      %52 = vector.load %arg14[%c0_42, %c0_43] : memref<1x256xf32, #tpu.memory_space<vmem>>, vector<1x256xf32>
      tpu.vector_store %arg14[%c0_42, %c0_43], %51 {strides = array<i32>} : memref<1x256xf32, #tpu.memory_space<vmem>>, vector<1x256xf32>,
    } else {
    }
    %c0 = arith.constant 0 : index
    %c0_1 = arith.constant 0 : index
    %c0_2 = arith.constant 0 : index
    %3 = vector.load %arg3[%c0, %c0_1, %c0_2] : memref<1x32x128xf32, #tpu.memory_space<vmem>>, vector<1x32x128xf32>
    %4 = vector.shape_cast %3 : vector<1x32x128xf32> to vector<32x128xf32>
    %c0_3 = arith.constant 0 : index
    %c0_4 = arith.constant 0 : index
    %5 = vector.load %arg5[%c0_3, %c0_4] : memref<8x32xf32, #tpu.memory_space<vmem>>, vector<8x32xf32>
    %cst = arith.constant dense<0.000000e+00> : vector<8x128xf32>
    %6 = tpu.matmul %5, %4, %cst {dimension_numbers = #tpu.dot_dimension_numbers<[1], [0], [0], [1], [0, 0, 1, 1], [], []>} : vector<8x32xf32>, vector<32x128xf32>, vector<8x128xf32> -> vector<8x128xf32>
    %c0_5 = arith.constant 0 : index
    %c0_6 = arith.constant 0 : index
    %7 = vector.load %arg6[%c0_5, %c0_6] : memref<32x32xf32, #tpu.memory_space<vmem>>, vector<32x32xf32>
    %cst_7 = arith.constant dense<0.000000e+00> : vector<32x128xf32>
    %8 = tpu.matmul %7, %4, %cst_7 {dimension_numbers = #tpu.dot_dimension_numbers<[1], [0], [0], [1], [0, 0, 1, 1], [], []>} : vector<32x32xf32>, vector<32x128xf32>, vector<32x128xf32> -> vector<32x128xf32>
    %c0_8 = arith.constant 0 : index
    %c0_9 = arith.constant 0 : index
    %9 = vector.load %arg7[%c0_8, %c0_9] : memref<32x1xf32, #tpu.memory_space<vmem>>, vector<32x1xf32>
    %10 = vector.broadcast %9 : vector<32x1xf32> to vector<32x128xf32>
    %11 = arith.addf %8, %10 : vector<32x128xf32>
    %c0_10 = arith.constant 0 : index
    %c0_11 = arith.constant 0 : index
    %12 = vector.load %arg12[%c0_10, %c0_11] : memref<8x256xf32, #tpu.memory_space<vmem>>, vector<8x256xf32>
    %cst_12 = arith.constant dense<0.000000e+00> : vector<128x256xf32>
    %13 = tpu.matmul %6, %12, %cst_12 {dimension_numbers = #tpu.dot_dimension_numbers<[0], [0], [1], [1], [0, 1, 1, 1], [], []>} : vector<8x128xf32>, vector<8x256xf32>, vector<128x256xf32> -> vector<128x256xf32>
    %c0_13 = arith.constant 0 : index
    %c0_14 = arith.constant 0 : index
    %c0_15 = arith.constant 0 : index
    %14 = vector.load %arg4[%c0_13, %c0_14, %c0_15] : memref<1x128x256xbf16, #tpu.memory_space<vmem>>, vector<1x128x256xbf16>
    %15 = vector.shape_cast %14 : vector<1x128x256xbf16> to vector<128x256xbf16>
    %16 = arith.extf %15 : vector<128x256xbf16> to vector<128x256xf32>
    %17 = arith.addf %13, %16 : vector<128x256xf32>
    %cst_16 = arith.constant dense<0xFF800000> : vector<128xf32>
    %18 = vector.multi_reduction <maximumf>, %17, %cst_16 [1] : vector<128x256xf32> to vector<128xf32>
    %19 = vector.shape_cast %18 : vector<128xf32> to vector<128x1xf32>
    %20 = vector.broadcast %19 : vector<128x1xf32> to vector<128x256xf32>
    %21 = arith.subf %17, %20 : vector<128x256xf32>
    %22 = math.exp %21 : vector<128x256xf32>
    %cst_17 = arith.constant dense<0.000000e+00> : vector<128xf32>
    %23 = vector.multi_reduction <add>, %22, %cst_17 [1] : vector<128x256xf32> to vector<128xf32>
    %24 = vector.shape_cast %23 : vector<128xf32> to vector<128x1xf32>
    %25 = tpu.reciprocal %24 {approx = true} : vector<128x1xf32> -> vector<128x1xf32>
    %26 = arith.mulf %24, %25 : vector<128x1xf32>
    %cst_18 = arith.constant 2.000000e+00 : f32
    %27 = vector.broadcast %cst_18 : f32 to vector<128x1xf32>
    %28 = arith.subf %27, %26 : vector<128x1xf32>
    %29 = arith.mulf %25, %28 : vector<128x1xf32>
    %30 = vector.broadcast %29 : vector<128x1xf32> to vector<128x256xf32>
    %31 = arith.mulf %22, %30 : vector<128x256xf32>
    %c0_19 = arith.constant 0 : index
    %c0_20 = arith.constant 0 : index
    %32 = vector.load %arg14[%c0_19, %c0_20] : memref<1x256xf32, #tpu.memory_space<vmem>>, vector<1x256xf32>
    %cst_21 = arith.constant dense<0.000000e+00> : vector<256xf32>
    %33 = vector.multi_reduction <add>, %31, %cst_21 [0] : vector<128x256xf32> to vector<256xf32>
    %34 = vector.shape_cast %33 : vector<256xf32> to vector<1x256xf32>
    %35 = arith.addf %32, %34 : vector<1x256xf32>
    %c0_22 = arith.constant 0 : index
    %c0_23 = arith.constant 0 : index
    %36 = vector.load %arg14[%c0_22, %c0_23] : memref<1x256xf32, #tpu.memory_space<vmem>>, vector<1x256xf32>
    tpu.vector_store %arg14[%c0_22, %c0_23], %35 {strides = array<i32>} : memref<1x256xf32, #tpu.memory_space<vmem>>, vector<1x256xf32>,
    %c0_24 = arith.constant 0 : index
    %c0_25 = arith.constant 0 : index
    %37 = vector.load %arg13[%c0_24, %c0_25] : memref<32x256xf32, #tpu.memory_space<vmem>>, vector<32x256xf32>
    %cst_26 = arith.constant dense<0.000000e+00> : vector<32x256xf32>
    %38 = tpu.matmul %11, %31, %cst_26 {dimension_numbers = #tpu.dot_dimension_numbers<[1], [0], [0], [1], [0, 0, 1, 1], [], []>} : vector<32x128xf32>, vector<128x256xf32>, vector<32x256xf32> -> vector<32x256xf32>
    %39 = arith.addf %37, %38 : vector<32x256xf32>
    %c0_27 = arith.constant 0 : index
    %c0_28 = arith.constant 0 : index
    %40 = vector.load %arg13[%c0_27, %c0_28] : memref<32x256xf32, #tpu.memory_space<vmem>>, vector<32x256xf32>
    tpu.vector_store %arg13[%c0_27, %c0_28], %39 {strides = array<i32>} : memref<32x256xf32, #tpu.memory_space<vmem>>, vector<32x256xf32>,
    %c1_i32 = arith.constant 1 : i32
    %41 = arith.cmpi eq, %arg1, %c1_i32 : i32
    %42 = arith.extui %41 : i1 to i32
    %c0_i32_29 = arith.constant 0 : i32
    %43 = arith.cmpi ne, %42, %c0_i32_29 : i32
    scf.if %43 {
      %c0_30 = arith.constant 0 : index
      %c0_31 = arith.constant 0 : index
      %44 = vector.load %arg13[%c0_30, %c0_31] : memref<32x256xf32, #tpu.memory_space<vmem>>, vector<32x256xf32>
      %c0_32 = arith.constant 0 : index
      %c0_33 = arith.constant 0 : index
      %45 = vector.load %arg14[%c0_32, %c0_33] : memref<1x256xf32, #tpu.memory_space<vmem>>, vector<1x256xf32>
      %cst_34 = arith.constant 9.99999971E-10 : f32
      %46 = vector.broadcast %cst_34 : f32 to vector<1x256xf32>
      %47 = arith.addf %46, %45 : vector<1x256xf32>
      %48 = tpu.reciprocal %47 {approx = true} : vector<1x256xf32> -> vector<1x256xf32>
      %49 = arith.mulf %47, %48 : vector<1x256xf32>
      %cst_35 = arith.constant 2.000000e+00 : f32
      %50 = vector.broadcast %cst_35 : f32 to vector<1x256xf32>
      %51 = arith.subf %50, %49 : vector<1x256xf32>
      %52 = arith.mulf %48, %51 : vector<1x256xf32>
      %53 = vector.broadcast %52 : vector<1x256xf32> to vector<32x256xf32>
      %54 = arith.mulf %44, %53 : vector<32x256xf32>
      %c0_36 = arith.constant 0 : index
      %c0_37 = arith.constant 0 : index
      %c0_38 = arith.constant 0 : index
      %55 = vector.load %arg2[%c0_36, %c0_37, %c0_38] : memref<1x32x256xf32, #tpu.memory_space<vmem>>, vector<1x32x256xf32>
      %56 = vector.shape_cast %55 : vector<1x32x256xf32> to vector<32x256xf32>
      %57 = arith.subf %56, %54 : vector<32x256xf32>
      %c0_39 = arith.constant 0 : index
      %c0_40 = arith.constant 0 : index
      %58 = vector.load %arg8[%c0_39, %c0_40] : memref<32x32xf32, #tpu.memory_space<vmem>>, vector<32x32xf32>
      %cst_41 = arith.constant dense<0.000000e+00> : vector<32x256xf32>
      %59 = tpu.matmul %58, %57, %cst_41 {dimension_numbers = #tpu.dot_dimension_numbers<[1], [0], [0], [1], [0, 0, 1, 1], [], []>} : vector<32x32xf32>, vector<32x256xf32>, vector<32x256xf32> -> vector<32x256xf32>
      %c0_42 = arith.constant 0 : index
      %c0_43 = arith.constant 0 : index
      %60 = vector.load %arg9[%c0_42, %c0_43] : memref<32x1xf32, #tpu.memory_space<vmem>>, vector<32x1xf32>
      %61 = vector.broadcast %60 : vector<32x1xf32> to vector<32x256xf32>
      %62 = arith.addf %59, %61 : vector<32x256xf32>
      %c0_44 = arith.constant 0 : index
      %c0_45 = arith.constant 0 : index
      %c0_46 = arith.constant 0 : index
      %63 = vector.load %arg10[%c0_44, %c0_45, %c0_46] : memref<1x32x256xf32, #tpu.memory_space<vmem>>, vector<1x32x256xf32>
      %64 = vector.shape_cast %63 : vector<1x32x256xf32> to vector<32x256xf32>
      %65 = vector.shape_cast %62 : vector<32x256xf32> to vector<1x32x256xf32>
      tpu.vector_store %arg10[%c0_44, %c0_45, %c0_46], %65 {strides = array<i32>} : memref<1x32x256xf32, #tpu.memory_space<vmem>>, vector<1x32x256xf32>,
      %cst_47 = arith.constant dense<0.000000e+00> : vector<32xf32>
      %66 = vector.multi_reduction <add>, %62, %cst_47 [1] : vector<32x256xf32> to vector<32xf32>
      %67 = vector.shape_cast %66 : vector<32xf32> to vector<32x1xf32>
      %cst_48 = arith.constant 3.906250e-03 : f32
      %68 = vector.broadcast %cst_48 : f32 to vector<32x1xf32>
      %69 = arith.mulf %67, %68 : vector<32x1xf32>
      %70 = vector.broadcast %69 : vector<32x1xf32> to vector<32x256xf32>
      %71 = arith.subf %62, %70 : vector<32x256xf32>
      %72 = arith.mulf %71, %71 : vector<32x256xf32>
      %cst_49 = arith.constant dense<0.000000e+00> : vector<32xf32>
      %73 = vector.multi_reduction <add>, %72, %cst_49 [1] : vector<32x256xf32> to vector<32xf32>
      %74 = vector.shape_cast %73 : vector<32xf32> to vector<32x1xf32>
      %75 = tpu.concatenate %69, %74 in 1 : vector<32x1xf32>, vector<32x1xf32> -> vector<32x2xf32>
      %c0_50 = arith.constant 0 : index
      %c0_51 = arith.constant 0 : index
      %c0_52 = arith.constant 0 : index
      %76 = vector.load %arg11[%c0_50, %c0_51, %c0_52] : memref<1x32x2xf32, #tpu.memory_space<vmem>>, vector<1x32x2xf32>
      %77 = vector.shape_cast %76 : vector<1x32x2xf32> to vector<32x2xf32>
      %78 = vector.shape_cast %75 : vector<32x2xf32> to vector<1x32x2xf32>
      tpu.vector_store %arg11[%c0_50, %c0_51, %c0_52], %78 {strides = array<i32>} : memref<1x32x2xf32, #tpu.memory_space<vmem>>, vector<1x32x2xf32>,
    } else {
    }
    return
  }
  func.func @transform_0(%arg0: i32, %arg1: i32) -> (i32, i32, i32) {
    %c0_i32 = arith.constant 0 : i32
    %c0_i32_0 = arith.constant 0 : i32
    %c0_i32_1 = arith.constant 0 : i32
    return %arg0, %c0_i32, %c0_i32_0 : i32, i32, i32
  }
  func.func @transform_1(%arg0: i32, %arg1: i32) -> (i32, i32, i32) {
    %c0_i32 = arith.constant 0 : i32
    %c0_i32_0 = arith.constant 0 : i32
    return %arg0, %c0_i32, %arg1 : i32, i32, i32
  }
  func.func @transform_2(%arg0: i32, %arg1: i32) -> (i32, i32, i32) {
    %c0_i32 = arith.constant 0 : i32
    %c0_i32_0 = arith.constant 0 : i32
    return %arg0, %arg1, %c0_i32 : i32, i32, i32
  }
  func.func @transform_3(%arg0: i32, %arg1: i32) -> (i32, i32) {
    %c0_i32 = arith.constant 0 : i32
    %c0_i32_0 = arith.constant 0 : i32
    %c0_i32_1 = arith.constant 0 : i32
    return %c0_i32, %c0_i32_0 : i32, i32
  }
  func.func @transform_4(%arg0: i32, %arg1: i32) -> (i32, i32) {
    %c0_i32 = arith.constant 0 : i32
    %c0_i32_0 = arith.constant 0 : i32
    %c0_i32_1 = arith.constant 0 : i32
    return %c0_i32, %c0_i32_0 : i32, i32
  }
  func.func @transform_5(%arg0: i32, %arg1: i32) -> (i32, i32) {
    %c0_i32 = arith.constant 0 : i32
    %c0_i32_0 = arith.constant 0 : i32
    %c0_i32_1 = arith.constant 0 : i32
    return %c0_i32, %c0_i32_0 : i32, i32
  }
  func.func @transform_6(%arg0: i32, %arg1: i32) -> (i32, i32) {
    %c0_i32 = arith.constant 0 : i32
    %c0_i32_0 = arith.constant 0 : i32
    %c0_i32_1 = arith.constant 0 : i32
    return %c0_i32, %c0_i32_0 : i32, i32
  }
  func.func @transform_7(%arg0: i32, %arg1: i32) -> (i32, i32) {
    %c0_i32 = arith.constant 0 : i32
    %c0_i32_0 = arith.constant 0 : i32
    %c0_i32_1 = arith.constant 0 : i32
    return %c0_i32, %c0_i32_0 : i32, i32
  }
  func.func @transform_8(%arg0: i32, %arg1: i32) -> (i32, i32, i32) {
    %c0_i32 = arith.constant 0 : i32
    %c0_i32_0 = arith.constant 0 : i32
    %c0_i32_1 = arith.constant 0 : i32
    return %arg0, %c0_i32, %c0_i32_0 : i32, i32, i32
  }
  func.func @transform_9(%arg0: i32, %arg1: i32) -> (i32, i32, i32) {
    %c0_i32 = arith.constant 0 : i32
    %c0_i32_0 = arith.constant 0 : i32
    %c0_i32_1 = arith.constant 0 : i32
    return %arg0, %c0_i32, %c0_i32_0 : i32, i32, i32
  }
}

module attributes {stable_mosaic.version = 11 : i64} {
  func.func @_bn_apply_kernel(%arg0: i32, %arg1: i32, %arg2: memref<1x32x256xf32, #tpu.memory_space<vmem>>, %arg3: memref<1x32x256xf32, #tpu.memory_space<vmem>>, %arg4: memref<32x1xf32, #tpu.memory_space<vmem>>, %arg5: memref<32x1xf32, #tpu.memory_space<vmem>>, %arg6: memref<1x32x256xf32, #tpu.memory_space<vmem>>) attributes {dimension_semantics = [#tpu.dimension_semantics<parallel>, #tpu.dimension_semantics<parallel>], iteration_bounds = array<i64: 2, 1>, scalar_prefetch = 0 : i64, scratch_operands = 0 : i64, tpu.core_type = #tpu.core_type<tc>, window_params = [{transform_indices = @transform_0, window_bounds = array<i64: 1, 32, 256>}, {transform_indices = @transform_1, window_bounds = array<i64: 1, 32, 256>}, {pipeline_mode = #tpu.pipeline_mode<synchronous>, transform_indices = @transform_2, window_bounds = array<i64: 32, 1>}, {pipeline_mode = #tpu.pipeline_mode<synchronous>, transform_indices = @transform_3, window_bounds = array<i64: 32, 1>}, {transform_indices = @transform_4, window_bounds = array<i64: 1, 32, 256>}]} {
    %c0 = arith.constant 0 : index
    %c0_0 = arith.constant 0 : index
    %c0_1 = arith.constant 0 : index
    %0 = vector.load %arg3[%c0, %c0_0, %c0_1] : memref<1x32x256xf32, #tpu.memory_space<vmem>>, vector<1x32x256xf32>
    %c0_2 = arith.constant 0 : index
    %c0_3 = arith.constant 0 : index
    %1 = vector.load %arg4[%c0_2, %c0_3] : memref<32x1xf32, #tpu.memory_space<vmem>>, vector<32x1xf32>
    %2 = vector.shape_cast %1 : vector<32x1xf32> to vector<1x32x1xf32>
    %3 = vector.broadcast %2 : vector<1x32x1xf32> to vector<1x32x256xf32>
    %4 = arith.mulf %0, %3 : vector<1x32x256xf32>
    %c0_4 = arith.constant 0 : index
    %c0_5 = arith.constant 0 : index
    %5 = vector.load %arg5[%c0_4, %c0_5] : memref<32x1xf32, #tpu.memory_space<vmem>>, vector<32x1xf32>
    %6 = vector.shape_cast %5 : vector<32x1xf32> to vector<1x32x1xf32>
    %7 = vector.broadcast %6 : vector<1x32x1xf32> to vector<1x32x256xf32>
    %8 = arith.addf %4, %7 : vector<1x32x256xf32>
    %c0_6 = arith.constant 0 : index
    %c0_7 = arith.constant 0 : index
    %c0_8 = arith.constant 0 : index
    %9 = vector.load %arg2[%c0_6, %c0_7, %c0_8] : memref<1x32x256xf32, #tpu.memory_space<vmem>>, vector<1x32x256xf32>
    %cst = arith.constant 0.000000e+00 : f32
    %10 = vector.broadcast %cst : f32 to vector<1x32x256xf32>
    %11 = arith.maximumf %8, %10 : vector<1x32x256xf32>
    %12 = arith.addf %9, %11 : vector<1x32x256xf32>
    %c0_9 = arith.constant 0 : index
    %c0_10 = arith.constant 0 : index
    %c0_11 = arith.constant 0 : index
    %13 = vector.load %arg6[%c0_9, %c0_10, %c0_11] : memref<1x32x256xf32, #tpu.memory_space<vmem>>, vector<1x32x256xf32>
    tpu.vector_store %arg6[%c0_9, %c0_10, %c0_11], %12 {strides = array<i32>} : memref<1x32x256xf32, #tpu.memory_space<vmem>>, vector<1x32x256xf32>,
    return
  }
  func.func @transform_0(%arg0: i32, %arg1: i32) -> (i32, i32, i32) {
    %c0_i32 = arith.constant 0 : i32
    %c0_i32_0 = arith.constant 0 : i32
    return %arg0, %c0_i32, %arg1 : i32, i32, i32
  }
  func.func @transform_1(%arg0: i32, %arg1: i32) -> (i32, i32, i32) {
    %c0_i32 = arith.constant 0 : i32
    %c0_i32_0 = arith.constant 0 : i32
    return %arg0, %c0_i32, %arg1 : i32, i32, i32
  }
  func.func @transform_2(%arg0: i32, %arg1: i32) -> (i32, i32) {
    %c0_i32 = arith.constant 0 : i32
    %c0_i32_0 = arith.constant 0 : i32
    %c0_i32_1 = arith.constant 0 : i32
    return %c0_i32, %c0_i32_0 : i32, i32
  }
  func.func @transform_3(%arg0: i32, %arg1: i32) -> (i32, i32) {
    %c0_i32 = arith.constant 0 : i32
    %c0_i32_0 = arith.constant 0 : i32
    %c0_i32_1 = arith.constant 0 : i32
    return %c0_i32, %c0_i32_0 : i32, i32
  }
  func.func @transform_4(%arg0: i32, %arg1: i32) -> (i32, i32, i32) {
    %c0_i32 = arith.constant 0 : i32
    %c0_i32_0 = arith.constant 0 : i32
    return %arg0, %c0_i32, %arg1 : i32, i32, i32
  }
}

</mosaic_0001>

<bundles_post_ra>
// kernel: _lambda_.3
= control target key start
LH: loop header
LB: loop body
LE: loop exit
PB: predicated region body
PF: predicated region fallthrough
CT: control target
= control target key end

     0   :  { %9 = vsyncpa [#allocation3], 0  ;;  %s828_s0 = inlined_call_operand.vmem [shape: f32[2,32,256], index: 0, kind: input, shape index: {}]   ;;  %s829_s1 = inlined_call_operand.vmem [shape: f32[2,32,256], index: 1, kind: input, shape index: {}]   ;;  %s830_s2 = inlined_call_operand.vmem [shape: f32[32,1], index: 2, kind: input, shape index: {}]   ;;  %s831_s3 = inlined_call_operand.vmem [shape: f32[32,1], index: 3, kind: input, shape index: {}]   ;;  %s832_s4 = inlined_call_operand.hbm [shape: f32[2,32,256], index: 4, kind: output, shape index: {}]  }
   0x1   :  { %11 = vsyncpa [#allocation3 + $0x1], 0  ;;  %s669_s15 = smov 0   ;;  %s671_s16 = smov 0  }
   0x2   :  { %s673_s17 = smov 0   ;;  %s675_s18 = smov 0  }
   0x3   :  { %s677_s19 = smov 0   ;;  %s679_s20 = smov 0  }
   0x4 LB: > { %s482_s21 = sadd.s32 4294967295, %s639_s20   ;;  %s483_s22 = sadd.s32 4294967294, %s639_s20   ;;  %s639_s20 = sphi %s679_s20, %s17_s20   ;;  %s635_s19 = sphi %s677_s19, %s839_s19   ;;  %s631_s18 = sphi %s675_s18, %s838_s18   ;;  %s627_s17 = sphi %s673_s17, %s837_s17   ;;  %s623_s16 = sphi %s671_s16, %s836_s16   ;;  %s619_s15 = sphi %s669_s15, %s835_s15  }
   0x5   : > { %s29_s23 = sadd.s32 1, %s635_s19  ;;  %s136_s24 = sadd.s32 1, %s627_s17 }
   0x6   : > { %p31_p0 = scmp.ge.s32.totalorder %s29_s23, 2  ;;  %p146_p1 = scmp.ne.s32.totalorder %s627_s17, %s623_s16 }
   0x7   : > { %p147_p2 = scmp.eq.s32.totalorder %s482_s21, 1  ;;  %p152_p3 = scmp.ne.s32.totalorder %s623_s16, %s619_s15 }
   0x8   : > { %s841_s23 = smov (%p31_p0, %s29_s23), 0  ;;  %p153_p5 = scmp.eq.s32.totalorder %s483_s22, 1 }
   0x9   : > { %p709_p4 = por %p147_p2, %p146_p1  ;;  %s131_s26 = ssub.s32 %s635_s19, %s841_s23 }
   0xa   : > { %p486_p6 = scmp.ge.s32.totalorder %s639_s20, 1  ;;  %p134_p7 = scmp.eq.s32.totalorder %s131_s26, 0 }
   0xb   : > { %p716_p8 = por %p153_p5, %p152_p3  ;;  %p203_p9 = scmp.lt.s32.totalorder %s639_s20, 3 }
   0xc   : > { %s722_s28 = scalar_select %p134_p7, %s627_s17, %s136_s24  }
   0xd   : > { %p204_p10 = pnand %p486_p6, %p203_p9 }
   0xe   : > { %p243_p11 = scmp.lt.s32.totalorder (!%p204_p10), %s631_s18, 1  ;;  %s239_s8 = sand.u32 (!%p204_p10), 1, %s623_s16  }
   0xf   : > { %207 = sbr.rel (%p204_p10) target bundleno = 166 (0xa6), region = 36  ;;  %s487_s12 = sshll.u32 (!%p204_p10), %s239_s8, 6 }
  0x10   : > { %s769_s13 = scalar_lea.vmem (!%p204_p10), [#allocation2], %s487_s12  ;;  %s499_s14 = sshll.u32 (!%p204_p10), %s631_s18, 6 }
  0x11   : > { %s381_s24 = scalar_lea.hbm (!%p204_p10), %s832_s4, %s499_s14  ;;  %s581_s9 = scalar_lea.hbm (!%p204_p10), %s832_s4, 128 }
  0x12   : > { %s384_s26 = sshll.u32 (!%p204_p10), %s381_s24, 4  ;;  %s385_s26 = int_to_ptr.hbm [resolvable:$true] %s384_s26 }
  0x14   : > { %v273_v0 = vld [vmem:[%s830_s2 + $0x10] sm:$0xff]  ;;  %v271_v1 = vld [vmem:[%s830_s2] sm:$0xff]  ;;  %v641_v2 = vmov 0   ;;  %v274_v4 = vld [vmem:[%s830_s2 + $0x18] sm:$0xff]  ;;  %s244_s29 = scalar_select %p243_p11, %s631_s18, 1 }
  0x15   : > { %559 = vset.pattern.permute.xlu1 %v641_v2  ;;  %558 = vset.pattern.permute.xlu0 %v641_v2  ;;  %v303_v3 = vld [vmem:[%s831_s3] sm:$0xff]  ;;  %v272_v5 = vld [vmem:[%s830_s2 + $0x8] sm:$0xff]  ;;  %v306_v7 = vld [vmem:[%s831_s3 + $0x18] sm:$0xff]  ;;  %s382_s18 = sshll.u32 %s769_s13, 4  ;;  %s383_s18 = int_to_ptr.vmem [resolvable:$true] %s382_s18 }
  0x16   : > { %287 = vperm.xlu1 %559, %v273_v0   ;;  %277 = vperm.xlu0 %558, %v271_v1   ;;  %v304_v6 = vld [vmem:[%s831_s3 + $0x8] sm:$0xff]  ;;  %v305_v8 = vld [vmem:[%s831_s3 + $0x10] sm:$0xff]  ;;  %s497_s30 = sshll.u32 %s244_s29, 6  ;;  %s368_s29 = scalar_lea.sflag [#allocation3], %s239_s8 }
  0x17   : > { %560 = vset.pattern.permute.xlu2 %v641_v2  ;;  %s753_s7 = scalar_lea.vmem %s829_s1, %s497_s30  ;;  %s761_s11 = scalar_lea.vmem %s828_s0, %s497_s30 }
  0x18   : > { %309 = vperm.xlu2 %560, %v303_v3   ;;  %v263_v9 = vld [vmem:[%s753_s7] sm:$0xff]  ;;  %v264_v10 = vld [vmem:[%s753_s7 + $0x8] sm:$0xff]  ;;  %v265_v22 = vld [vmem:[%s753_s7 + $0x10] sm:$0xff]  ;;  %s575_s30 = sshra.s32 %s385_s26, 4  ;;  %s576_s30 = int_to_ptr.hbm [resolvable:$true] %s575_s30 }
  0x19   : > { %v335_v18 = vld [vmem:[%s761_s11] sm:$0xff]  ;;  %v336_v19 = vld [vmem:[%s761_s11 + $0x8] sm:$0xff]  ;;  %v266_v23 = vld [vmem:[%s753_s7 + $0x18] sm:$0xff]  ;;  %s577_s5 = scalar_lea.hbm %s576_s30, 64  ;;  %p582_p1 = scmp.lt.s32.totalorder %s576_s30, %s832_s4 }
  0x1a   : > { %v267_v31 = vld [vmem:[%s753_s7 + $0x20] sm:$0xff]  ;;  %v268_v32 = vld [vmem:[%s753_s7 + $0x28] sm:$0xff]  ;;  %v269_v33 = vld [vmem:[%s753_s7 + $0x30] sm:$0xff]  ;;  %p578_p12 = scmp.ne.s32.totalorder %s576_s30, %s577_s5  ;;  %p583_p2 = scmp.lt.s32.totalorder %s581_s9, %s577_s5 }
  0x1b   : > { %v270_v36 = vld [vmem:[%s753_s7 + $0x38] sm:$0xff]  ;;  %v337_v37 = vld [vmem:[%s761_s11 + $0x10] sm:$0xff]  ;;  %v339_v55 = vld [vmem:[%s761_s11 + $0x20] sm:$0xff] }
  0x1c   : > { %v338_v38 = vld [vmem:[%s761_s11 + $0x18] sm:$0xff]  ;;  %v341_v53 = vld [vmem:[%s761_s11 + $0x30] sm:$0xff]  ;;  %v340_v58 = vld [vmem:[%s761_s11 + $0x28] sm:$0xff]  ;;  %p579_p13 = pnand %p578_p12, %p709_p4  ;;  %p584_p3 = por %p583_p2, %p582_p1 }
  0x1d   : > { %v342_v54 = vld [vmem:[%s761_s11 + $0x38] sm:$0xff] }
  0x1e   : > { %292 = vperm.xlu1 %559, %v274_v4   ;;  %282 = vperm.xlu0 %558, %v272_v5   ;;  %p580_p0 = pneg %p579_p13 }
  0x20   : > { %314 = vperm.xlu2 %560, %v304_v6   ;;  %p585_p5 = pnand %p584_p3, %p580_p0 }
  0x26   : > { %324 = vperm.xlu1 %559, %v306_v7   ;;  %319 = vperm.xlu0 %558, %v305_v8  }
  0x72   : > { %v310_v11 = vpop.permute.xlu2 %309 }
  0x7a   : > { %v315_v30 = vpop.permute.xlu2 %314 }
  0x88   : > { %v288_v12 = vpop.permute.xlu1 %287  ;;  %v278_v13 = vpop.permute.xlu0 %277 }
  0x89   : > { %v295_v14 = vmul.f32 %v278_v13, %v263_v9  ;;  %v296_v15 = vmul.f32 %v278_v13, %v264_v10  ;;  %v299_v41 = vmul.f32 %v288_v12, %v267_v31  ;;  %v300_v42 = vmul.f32 %v288_v12, %v268_v32 }
  0x8b   : > { %v327_v16 = vadd.f32 %v310_v11, %v295_v14  ;;  %v328_v17 = vadd.f32 %v310_v11, %v296_v15 }
  0x8d   : > { %v343_v20 = vmax.f32 %v327_v16, 0.0  ;;  %v344_v21 = vmax.f32 %v328_v17, 0.0 }
  0x8f   : > { %v351_v24 = vadd.f32 %v343_v20, %v335_v18  ;;  %v352_v25 = vadd.f32 %v344_v21, %v336_v19 }
  0x90   : > { %v293_v26 = vpop.permute.xlu1 %292  ;;  %v283_v27 = vpop.permute.xlu0 %282 }
  0x91   : > { %359 = vst [vmem:[%s769_s13] sm:$0xff] %v351_v24  ;;  %v297_v28 = vmul.f32 %v283_v27, %v265_v22  ;;  %v298_v29 = vmul.f32 %v283_v27, %v266_v23  ;;  %v301_v43 = vmul.f32 %v293_v26, %v269_v33  ;;  %v302_v44 = vmul.f32 %v293_v26, %v270_v36 }
  0x92   : > { %360 = vst [vmem:[%s769_s13 + $0x8] sm:$0xff] %v352_v25 }
  0x93   : > { %v329_v34 = vadd.f32 %v315_v30, %v297_v28  ;;  %v330_v35 = vadd.f32 %v315_v30, %v298_v29 }
  0x95   : > { %v345_v39 = vmax.f32 %v329_v34, 0.0  ;;  %v346_v40 = vmax.f32 %v330_v35, 0.0 }
  0x97   : > { %v353_v45 = vadd.f32 %v345_v39, %v337_v37  ;;  %v354_v46 = vadd.f32 %v346_v40, %v338_v38 }
  0x98   : > { %v325_v47 = vpop.permute.xlu1 %324  ;;  %v320_v48 = vpop.permute.xlu0 %319 }
  0x99   : > { %361 = vst [vmem:[%s769_s13 + $0x10] sm:$0xff] %v353_v45  ;;  %v333_v49 = vadd.f32 %v325_v47, %v301_v43  ;;  %v334_v50 = vadd.f32 %v325_v47, %v302_v44  ;;  %v331_v51 = vadd.f32 %v320_v48, %v299_v41  ;;  %v332_v52 = vadd.f32 %v320_v48, %v300_v42 }
  0x9a   : > { %362 = vst [vmem:[%s769_s13 + $0x18] sm:$0xff] %v354_v46 }
  0x9b   : > { %v349_v56 = vmax.f32 %v333_v49, 0.0  ;;  %v350_v57 = vmax.f32 %v334_v50, 0.0  ;;  %v347_v59 = vmax.f32 %v331_v51, 0.0  ;;  %v348_v60 = vmax.f32 %v332_v52, 0.0 }
  0x9d   : > { %v357_v61 = vadd.f32 %v349_v56, %v341_v53  ;;  %v358_v62 = vadd.f32 %v350_v57, %v342_v54  ;;  %v355_v63 = vadd.f32 %v347_v59, %v339_v55  ;;  %v356_v0 = vadd.f32 %v348_v60, %v340_v58 }
  0x9f   : > { %365 = vst [vmem:[%s769_s13 + $0x30] sm:$0xff] %v357_v61 }
  0xa0   : > { %366 = vst [vmem:[%s769_s13 + $0x38] sm:$0xff] %v358_v62 }
  0xa1   : > { %363 = vst [vmem:[%s769_s13 + $0x20] sm:$0xff] %v355_v63 }
  0xa2   : > { %364 = vst [vmem:[%s769_s13 + $0x28] sm:$0xff] %v356_v0 }
  0xa3   : > { %588 = shalt.err (!%p585_p5)
}
  0xa4   : > { %s642_s8 = smov 256   ;;  %s643_s12 = smov 16  }
  0xa5   : > { %500 = dma.vmem_to_hbm [thread:$0]  (%p709_p4), %s383_s18, 1024, %s385_s26, %s368_s29, %s642_s8, %s642_s8, %s643_s12  }
  0xa6 PF: > { %p506_p6 = scmp.ge.s32.totalorder %s639_s20, 2  ;;  %s399_s13 = sand.u32 1, %s619_s15  }
  0xa7   : > { %s400_s14 = scalar_lea.sflag [#allocation3], %s399_s13 }
  0xa8   : > { %p503_p7 = pnand %p506_p6, %p716_p8 }
  0xaa   : > { %p504_p9 = pneg %p503_p7 }
  0xac   : > { %614 = dma.done.wait (%p504_p9), %s400_s14, 1024  }
  0xad   : > { %616 = vsyncadd (%p504_p9), %s400_s14, 4294966272  ;;  %s17_s20 = sadd.s32 1, %s639_s20   ;;  %s835_s15 = smov %s623_s16 }
  0xae   : > { %p14_p10 = scmp.ge.s32.totalorder %s17_s20, 4   ;;  %s836_s16 = smov %s627_s17 }
  0xaf   : > { %s837_s17 = smov %s722_s28  ;;  %s838_s18 = smov %s635_s19 }
  0xb0   : > { %s839_s19 = smov %s841_s23  ;;  %16 = sbr.rel (!%p14_p10) target bundleno = 4 (0x4), region = 74 }
  0xb5   :  { %406 = vsyncpa [#allocation3], 1 }
  0xb6   :  { %408 = vsyncpa [#allocation3 + $0x1], 1 }

// kernel: _lambda_.2
= control target key start
LH: loop header
LB: loop body
LE: loop exit
PB: predicated region body
PF: predicated region fallthrough
CT: control target
= control target key end

     0   :  { %s2682_s0 = inlined_call_operand.vmem [shape: f32[2,32,256], index: 0, kind: input, shape index: {}, may-alias: {0,1}]   ;;  %s2683_s1 = inlined_call_operand.vmem [shape: f32[2,32,256], index: 1, kind: input, shape index: {}, may-alias: {0,1}]   ;;  %s2684_s2 = inlined_call_operand.vmem [shape: bf16[2,256,256], index: 2, kind: input, shape index: {}]   ;;  %s2685_s3 = inlined_call_operand.vmem [shape: f32[8,32], index: 3, kind: input, shape index: {}]   ;;  %s2686_s4 = inlined_call_operand.vmem [shape: f32[32,32], index: 4, kind: input, shape index: {}]   ;;  %s2687_s5 = inlined_call_operand.vmem [shape: f32[32,1], index: 5, kind: input, shape index: {}]   ;;  %s2688_s6 = inlined_call_operand.vmem [shape: f32[32,32], index: 6, kind: input, shape index: {}]   ;;  %s2689_s7 = inlined_call_operand.vmem [shape: f32[32,1], index: 7, kind: input, shape index: {}]   ;;  %s2690_s8 = inlined_call_operand.vmem [shape: f32[2,32,256], index: 8, kind: output, shape index: {0}]   ;;  %s2691_s9 = inlined_call_operand.vmem [shape: f32[2,32,2], index: 9, kind: output, shape index: {1}]  }
   0x1   :  { %2702 = sst [smem:[#allocation21_spill]] %s2683_s1 }
   0x2   :  { %s2030_s30 = smov 0   ;;  %s2032_s10 = smov 0  }
   0x3   :  { %s2034_s11 = smov 0   ;;  %s2036_s12 = smov 0  }
   0x4   :  { %s2038_s13 = smov 0   ;;  %s2040_s14 = smov 0  }
   0x5   :  { %s2042_s15 = smov 0  }
   0x6 LB: > { %2703 = sst [smem:[#allocation6_spill]] %s1967_s13  ;;  %s29_s16 = sadd.s32 1, %s1967_s13  ;;  %s1975_s15 = sphi %s2042_s15, %s20_s15   ;;  %s1971_s14 = sphi %s2040_s14, %s2733_s14   ;;  %s1967_s13 = sphi %s2038_s13, %s2732_s13   ;;  %s1963_s12 = sphi %s2036_s12, %s2731_s12   ;;  %s1959_s11 = sphi %s2034_s11, %s2730_s11   ;;  %s1955_s10 = sphi %s2032_s10, %s2735_s10   ;;  %s1951_s30 = sphi %s2030_s30, %s2734_s30  }
   0x7   : > { %2704 = sst [smem:[#allocation7_spill]] %s1971_s14  ;;  %p30_p0 = scmp.ge.s32.totalorder %s29_s16, 2 }
   0x8   : > { %s32_s17 = sadd.s32 1, %s1971_s14  ;;  %p74_p1 = scmp.ne.s32.totalorder %s1955_s10, %s1951_s30 }
   0x9   : > { %p75_p2 = scmp.eq.s32.totalorder %s1975_s15, 0  ;;  %s2737_s16 = smov (%p30_p0, %s29_s16), 0 }
   0xa   : > { %2705 = sst [smem:[#allocation8_spill]] %s2737_s16  ;;  %s2739_s17 = smov (!%p30_p0, %s32_s17), %s1971_s14 }
   0xb   : > { %p76_p3 = por %p75_p2, %p74_p1  ;;  %p34_p4 = scmp.ge.s32.totalorder %s2739_s17, 2 }
   0xc   : > { %s63_s18 = ssub.s32 %s1967_s13, %s2737_s16  ;;  %s67_s21 = sadd.s32 1, %s1955_s10 }
   0xd   : > { %s2741_s17 = smov (%p34_p4, %s2739_s17), 0  ;;  %p1674_p6 = scmp.ge.s32.totalorder %s1975_s15, 4 }
   0xe   : > { %2706 = sst [smem:[#allocation9_spill]] %s2741_s17  ;;  %s62_s19 = ssub.s32 %s1971_s14, %s2741_s17 }
   0xf   : > { %s64_s20 = sor.u32 %s63_s18, %s62_s19 }
  0x10   : > { %p65_p5 = scmp.eq.s32.totalorder %s64_s20, 0  ;;  %300 = sbr.rel (%p1674_p6) target bundleno = 35 (0x23), region = 36 }
  0x12   : > { %s2081_s22 = scalar_select %p65_p5, %s1955_s10, %s67_s21  }
  0x14   : > { %2707 = sst [smem:[#allocation10_spill]] %s2081_s22 }
  0x15   : > { %311 = sbr.rel (!%p76_p3) target bundleno = 35 (0x23), region = 44  ;;  %s313_s23 = sand.u32 (%p76_p3), 1, %s1955_s10  }
  0x16   : > { %s1676_s24 = sshll.u32 (%p76_p3), %s1971_s14, 3  ;;  %s1675_s25 = sshll.u32 (%p76_p3), %s313_s23, 5 }
  0x17   : > { %s317_s26 = sadd.s32 (%p76_p3), %s1967_s13, %s1676_s24  ;;  %s2708_s1 = sld [smem:[#allocation21_spill]] (%p76_p3) }
  0x18   : > { %s1677_s27 = sshll.u32 (%p76_p3), %s317_s26, 3  ;;  %s315_s19 = scalar_lea.vmem (%p76_p3), [#allocation5], %s1675_s25 }
  0x1d   : > { %s319_s18 = scalar_lea.vmem %s2708_s1, %s1677_s27 }
  0x1e   : > { %v354_v0 = vld [vmem:[%s319_s18] sm:$0xff]  ;;  %v356_v1 = vld [vmem:[%s319_s18 + $0x10] sm:$0xff] }
  0x1f   : > { %v358_v2 = vld [vmem:[%s319_s18 + $0x20] sm:$0xff]  ;;  %355 = vst [vmem:[%s315_s19] sm:$0xff] %v354_v0  ;;  %v360_v3 = vld [vmem:[%s319_s18 + $0x30] sm:$0xff] }
  0x20   : > { %357 = vst [vmem:[%s315_s19 + $0x8] sm:$0xff] %v356_v1 }
  0x21   : > { %359 = vst [vmem:[%s315_s19 + $0x10] sm:$0xff] %v358_v2 }
  0x22   : > { %361 = vst [vmem:[%s315_s19 + $0x18] sm:$0xff] %v360_v3 }
  0x23 PF: > { %p1678_p7 = scmp.ge.s32.totalorder %s1975_s15, 1  ;;  %p380_p8 = scmp.lt.s32.totalorder %s1975_s15, 5 }
  0x25   : > { %p381_p9 = pnand %p1678_p7, %p380_p8 }
  0x27   : > { %384 = sbr.rel (%p381_p9) target bundleno = 1693 (0x69d), region = 86 }
  0x2c   : > { %s387_s20 = sand.u32 1, %s1951_s30   ;;  %p442_p10 = scmp.lt.s32.totalorder %s1963_s12, 1 }
  0x2d   : > { %s1679_s21 = sshll.u32 %s387_s20, 5  ;;  %s1682_s23 = sshll.u32 %s1959_s11, 4 }
  0x2e   : > { %p450_p11 = scmp.lt.s32.totalorder %s1682_s23, 31  ;;  %s2743_s12 = smov (!%p442_p10, %s1963_s12), 1 }
  0x2f   : > { %s1741_s24 = sshll.u32 %s2743_s12, 6  ;;  %s1743_s25 = sshll.u32 %s2743_s12, 5 }
  0x30   : > { %s2745_s23 = smov (!%p450_p11, %s1682_s23), 31  ;;  %s2099_s28 = scalar_lea.vmem %s2682_s0, %s1741_s24 }
  0x31   : > { %s1683_s29 = sshll.u32 %s2745_s23, 1  ;;  %s2104_s17 = scalar_lea.vmem %s2690_s8, %s1741_s24 }
  0x32   : > { %s454_s18 = sadd.s32 %s1741_s24, %s1683_s29  ;;  %s2109_s14 = scalar_lea.vmem %s2691_s9, %s1743_s25 }
  0x33   : > { %s1685_s30 = sshll.u32 %s454_s18, 2  ;;  %s2116_s26 = scalar_lea.vmem [#allocation5], %s1679_s21 }
  0x34   : > { %s2114_s22 = scalar_lea.vmem %s2684_s2, %s1685_s30  ;;  %p1690_p12 = scmp.ne.s32.totalorder %s1959_s11, 0 }
  0x36   : > { %471 = sbr.rel (%p1690_p12) target bundleno = 195 (0xc3), region = 94 }
  0x3b   : > { %v478_v4 = vld [vmem:[%s2099_s28 + $0x30] sm:$0xff]  ;;  %v479_v5 = vld [vmem:[%s2099_s28 + $0x38] sm:$0xff]  ;;  %v476_v6 = vld [vmem:[%s2099_s28 + $0x20] sm:$0xff]  ;;  %vm481_vm0 = vcmask 261120   ;;  %v1977_v13 = vmov 0.0   ;;  %v535_v14 = vlaneseq }
  0x3c   : > { %497 = vmatpush.msra.mxu0 %v478_v4  ;;  %517 = vmatpush.msra.mxu1 %v479_v5  ;;  %v477_v7 = vld [vmem:[%s2099_s28 + $0x28] sm:$0xff]  ;;  %v474_v8 = vld [vmem:[%s2099_s28 + $0x10] sm:$0xff]  ;;  %v475_v9 = vld [vmem:[%s2099_s28 + $0x18] sm:$0xff]  ;;  %527 = vst [vmem:[#allocation3 + $0x28] sm:$0xff] %v1977_v13 }
  0x3d   : > { %v472_v10 = vld [vmem:[%s2099_s28] sm:$0xff]  ;;  %v473_v11 = vld [vmem:[%s2099_s28 + $0x8] sm:$0xff]  ;;  %528 = vst [vmem:[#allocation3 + $0x10] sm:$0xff] %v1977_v13  ;;  %vm537_vm1 = vcmp.lt.s32.totalorder %v535_v14, 256 }
  0x3e   : > { %498 = vmatpush.msra.mxu0 %v476_v6  ;;  %518 = vmatpush.msra.mxu1 %v477_v7  ;;  %v480_v12 = vld [vmem:[%s2685_s3] sm:$0xff]  ;;  %529 = vst [vmem:[#allocation3 + $0x8] sm:$0xff] %v1977_v13 }
  0x3f   : > { %530 = vst [vmem:[#allocation3 + $0x18] sm:$0xff] %v1977_v13 }
  0x40   : > { %499 = vmatpush.msra.mxu0 %v474_v8  ;;  %519 = vmatpush.msra.mxu1 %v475_v9  ;;  %531 = vst [vmem:[#allocation3 + $0x20] sm:$0xff] %v1977_v13 }
  0x41   : > { %532 = vst [vmem:[#allocation3 + $0x38] sm:$0xff] %v1977_v13 }
  0x42   : > { %500 = vmatpush.msra.mxu0 %v472_v10  ;;  %520 = vmatpush.msra.mxu1 %v473_v11  ;;  %533 = vst [vmem:[#allocation3 + $0x30] sm:$0xff] %v1977_v13 }
  0x43   : > { %1691 = vmatmul.msk.f32.vlgmr.msra.gmra.mxu0 %vm481_vm0, %v480_v12  ;;  %1692 = vmatmul.msk.f32.vlgmr.msra.gmra.mxu1 %vm481_vm0, %v480_v12  ;;  %534 = vst [vmem:[#allocation3] sm:$0xff] %v1977_v13 }
  0x44   : > { %539 = vst.msk [vmem:[#allocation4] sm:$0x3] %vm537_vm1, %v1977_v13 }
  0xc0   : > { %v502_v15 = vpop.f32.mrf.mxu0  ;;  %v522_v16 = vpop.f32.mrf.mxu1 }
  0xc1   : > { %525 = vst [vmem:[#allocation2] sm:$0xff] %v502_v15 }
  0xc2   : > { %526 = vst [vmem:[#allocation2 + $0x8] sm:$0xff] %v522_v16 }
  0xc3 PF: > { %v543_v17 = vld [vmem:[%s2116_s26 + $0x18] sm:$0xff]  ;;  %v542_v18 = vld [vmem:[%s2116_s26 + $0x10] sm:$0xff]  ;;  %v541_v19 = vld [vmem:[%s2116_s26 + $0x8] sm:$0xff]  ;;  %vm545_vm2 = vcmask 261120   ;;  %vm720_vm3 = vcmask 64512   ;;  %vm1233_vm4 = vcmask 1040384  }
  0xc4   : > { %561 = vmatpush.msra.mxu0 %v543_v17  ;;  %1744 = vmatpush.msra.mxu1 %v543_v17  ;;  %v540_v20 = vld [vmem:[%s2116_s26] sm:$0xff]  ;;  %v544_v21 = vld [vmem:[%s2685_s3] sm:$0xff]  ;;  %v570_v22 = vld [vmem:[%s2686_s4 + $0x8] sm:$0xff]  ;;  %p1730_p13 = scmp.ne.s32.totalorder %s1959_s11, 1 }
  0xc5   : > { %v569_v23 = vld [vmem:[%s2686_s4] sm:$0xff]  ;;  %v571_v26 = vld [vmem:[%s2686_s4 + $0x10] sm:$0xff]  ;;  %v572_v27 = vld [vmem:[%s2686_s4 + $0x18] sm:$0xff] }
  0xc6   : > { %562 = vmatpush.msra.mxu0 %v542_v18  ;;  %1745 = vmatpush.msra.mxu1 %v542_v18  ;;  %v652_v63 = vld [vmem:[%s2114_s22 + $0x60] sm:$0xff]  ;;  %v651_v4 = vld [vmem:[%s2114_s22 + $0x58] sm:$0xff]  ;;  %v649_v16 = vld [vmem:[%s2114_s22 + $0x48] sm:$0xff] }
  0xc7   : > { %v680_v2 = vunpack.c.l.bf16 %v652_v63  ;;  %v681_v3 = vunpack.c.h.bf16 %v652_v63  ;;  %v678_v9 = vunpack.c.l.bf16 %v651_v4  ;;  %v679_v10 = vunpack.c.h.bf16 %v651_v4 }
  0xc8   : > { %563 = vmatpush.msra.mxu0 %v541_v19  ;;  %1746 = vmatpush.msra.mxu1 %v541_v19  ;;  %v638_v24 = vld [vmem:[#allocation2] sm:$0xff] }
  0xc9   : > { %v639_v25 = vld [vmem:[#allocation2 + $0x8] sm:$0xff]  ;;  %1748 = vmatpush.msra.mxu2 %v638_v24 }
  0xca   : > { %564 = vmatpush.msra.mxu0 %v540_v20  ;;  %1747 = vmatpush.msra.mxu1 %v540_v20 }
  0xcb   : > { %1693 = vmatmul.msk.f32.vlgmr.msra.gmra.mxu0 %vm545_vm2, %v544_v21  ;;  %1695 = vmatmul.msk.f32.vlgmr.msra.gmra.mxu1 %vm545_vm2, %v570_v22  ;;  %v675_v21 = vunpack.c.h.bf16 %v649_v16 }
  0xcc   : > { %621 = vmatpush.msrb.mxu0 %v543_v17  ;;  %849 = vmatpush.msrb.mxu1 %v639_v25 }
  0xcd   : > { %1749 = vmatpush.msra.mxu3 %v639_v25 }
  0xce   : > { %622 = vmatpush.msrb.mxu0 %v542_v18 }
  0xd0   : > { %623 = vmatpush.msrb.mxu0 %v541_v19  ;;  %v654_v19 = vld [vmem:[%s2114_s22 + $0x70] sm:$0xff] }
  0xd2   : > { %624 = vmatpush.msrb.mxu0 %v540_v20  ;;  %v674_v20 = vunpack.c.l.bf16 %v649_v16 }
  0xd3   : > { %1694 = vmatmul.msk.f32.vlgmr.msrb.gmra.mxu0 %vm545_vm2, %v569_v23  ;;  %1696 = vmatmul.msk.f32.gmra.mxu1 %vm545_vm2, %v571_v26  ;;  %v684_v23 = vunpack.c.l.bf16 %v654_v19 }
  0xd4   : > { %784 = vmatpush.msra.mxu0 %v638_v24  ;;  %v685_v24 = vunpack.c.h.bf16 %v654_v19  ;;  %v643_v19 = vld [vmem:[%s2114_s22 + $0x18] sm:$0xff] }
  0xdb   : > { %1697 = vmatmul.msk.f32.gmra.mxu1 %vm545_vm2, %v572_v27  ;;  %v647_v27 = vld [vmem:[%s2114_s22 + $0x38] sm:$0xff] }
 0x148   : > { %v566_v28 = vpop.f32.mrf.mxu0  ;;  %v2202_v55 = vpop.f32.mrf.mxu1 }
 0x149   : > { %688 = vxpose.xlu0.b32.start.end [1/1] (short) %v566_v28, 128  ;;  %2709 = vst [vmem:[#allocation11_spill] sm:$0xff] %v2202_v55 }
 0x150   : > { %v2208_v60 = vpop.f32.mrf.mxu1  ;;  %v2211_v0 = vpop.f32.mrf.mxu0 }
 0x151   : > { %2710 = vst [vmem:[#allocation12_spill] sm:$0xff] %v2208_v60 }
 0x152   : > { %2711 = vst [vmem:[#allocation13_spill] sm:$0xff] %v2211_v0 }
 0x158   : > { %v2213_v1 = vpop.f32.mrf.mxu1 }
 0x159   : > { %2712 = vst [vmem:[#allocation14_spill] sm:$0xff] %v2213_v1 }
 0x1ed   : > { %v704_v29 = vpop.trf.xlu0 }
 0x1ee   : > { %1698 = vmatmul.msk.f32.vlgmr.msra.gmra.mxu0 %vm720_vm3, %v704_v29  ;;  %1714 = vmatmul.msk.f32.vlgmr.msrb.gmra.mxu1 %vm720_vm3, %v704_v29 }
 0x1f5   : > { %v705_v30 = vpop.trf.xlu0 }
 0x1f6   : > { %1699 = vmatmul.msk.f32.gmra.mxu0 %vm720_vm3, %v705_v30  ;;  %1715 = vmatmul.msk.f32.gmra.mxu1 %vm720_vm3, %v705_v30  ;;  %v653_v30 = vld [vmem:[%s2114_s22 + $0x68] sm:$0xff] }
 0x1fd   : > { %v706_v31 = vpop.trf.xlu0 }
 0x1fe   : > { %1700 = vmatmul.msk.f32.gmra.mxu0 %vm720_vm3, %v706_v31  ;;  %1716 = vmatmul.msk.f32.gmra.mxu1 %vm720_vm3, %v706_v31 }
 0x205   : > { %v707_v32 = vpop.trf.xlu0 }
 0x206   : > { %1701 = vmatmul.msk.f32.gmra.mxu0 %vm720_vm3, %v707_v32  ;;  %1717 = vmatmul.msk.f32.gmra.mxu1 %vm720_vm3, %v707_v32 }
 0x20d   : > { %v708_v33 = vpop.trf.xlu0 }
 0x20e   : > { %1702 = vmatmul.msk.f32.vlgmr.msra.gmra.mxu2 %vm720_vm3, %v708_v33  ;;  %1718 = vmatmul.msk.f32.vlgmr.msra.gmra.mxu3 %vm720_vm3, %v708_v33 }
 0x215   : > { %v709_v34 = vpop.trf.xlu0 }
 0x216   : > { %1703 = vmatmul.msk.f32.gmra.mxu2 %vm720_vm3, %v709_v34  ;;  %1719 = vmatmul.msk.f32.gmra.mxu3 %vm720_vm3, %v709_v34 }
 0x21d   : > { %v710_v35 = vpop.trf.xlu0 }
 0x21e   : > { %1704 = vmatmul.msk.f32.gmra.mxu2 %vm720_vm3, %v710_v35  ;;  %1720 = vmatmul.msk.f32.gmra.mxu3 %vm720_vm3, %v710_v35  ;;  %v670_v35 = vunpack.c.l.bf16 %v647_v27 }
 0x225   : > { %v711_v36 = vpop.trf.xlu0 }
 0x226   : > { %1705 = vmatmul.msk.f32.gmra.mxu2 %vm720_vm3, %v711_v36  ;;  %1721 = vmatmul.msk.f32.gmra.mxu3 %vm720_vm3, %v711_v36  ;;  %v671_v36 = vunpack.c.h.bf16 %v647_v27  ;;  %v662_v27 = vunpack.c.l.bf16 %v643_v19 }
 0x22d   : > { %v712_v37 = vpop.trf.xlu0 }
 0x22e   : > { %1706 = vmatmul.msk.f32.gmra.mxu2 %vm720_vm3, %v712_v37  ;;  %1722 = vmatmul.msk.f32.gmra.mxu3 %vm720_vm3, %v712_v37  ;;  %v655_v37 = vld [vmem:[%s2114_s22 + $0x78] sm:$0xff] }
 0x235   : > { %v713_v38 = vpop.trf.xlu0 }
 0x236   : > { %1707 = vmatmul.msk.f32.gmra.mxu2 %vm720_vm3, %v713_v38  ;;  %1723 = vmatmul.msk.f32.gmra.mxu3 %vm720_vm3, %v713_v38  ;;  %v682_v38 = vunpack.c.l.bf16 %v653_v30 }
 0x23d   : > { %v714_v39 = vpop.trf.xlu0 }
 0x23e   : > { %1708 = vmatmul.msk.f32.gmra.mxu2 %vm720_vm3, %v714_v39  ;;  %1724 = vmatmul.msk.f32.gmra.mxu3 %vm720_vm3, %v714_v39  ;;  %v683_v39 = vunpack.c.h.bf16 %v653_v30  ;;  %v663_v30 = vunpack.c.h.bf16 %v643_v19 }
 0x245   : > { %v715_v40 = vpop.trf.xlu0 }
 0x246   : > { %1709 = vmatmul.msk.f32.gmra.mxu2 %vm720_vm3, %v715_v40  ;;  %1725 = vmatmul.msk.f32.gmra.mxu3 %vm720_vm3, %v715_v40 }
 0x24d   : > { %v716_v41 = vpop.trf.xlu0 }
 0x24e   : > { %1710 = vmatmul.msk.f32.gmra.mxu2 %vm720_vm3, %v716_v41  ;;  %1726 = vmatmul.msk.f32.gmra.mxu3 %vm720_vm3, %v716_v41 }
 0x255   : > { %v717_v42 = vpop.trf.xlu0 }
 0x256   : > { %1711 = vmatmul.msk.f32.gmra.mxu2 %vm720_vm3, %v717_v42  ;;  %1727 = vmatmul.msk.f32.gmra.mxu3 %vm720_vm3, %v717_v42  ;;  %v686_v42 = vunpack.c.l.bf16 %v655_v37 }
 0x25d   : > { %v718_v43 = vpop.trf.xlu0 }
 0x25e   : > { %1712 = vmatmul.msk.f32.gmra.mxu2 %vm720_vm3, %v718_v43  ;;  %1728 = vmatmul.msk.f32.gmra.mxu3 %vm720_vm3, %v718_v43  ;;  %v687_v43 = vunpack.c.h.bf16 %v655_v37 }
 0x265   : > { %v719_v44 = vpop.trf.xlu0 }
 0x266   : > { %1713 = vmatmul.msk.f32.gmra.mxu2 %vm720_vm3, %v719_v44  ;;  %1729 = vmatmul.msk.f32.gmra.mxu3 %vm720_vm3, %v719_v44  ;;  %v645_v44 = vld [vmem:[%s2114_s22 + $0x28] sm:$0xff] }
 0x26b   : > { %v2222_v12 = vpop.f32.mrf.mxu0  ;;  %v2224_v13 = vpop.f32.mrf.mxu1 }
 0x273   : > { %v2234_v25 = vpop.f32.mrf.mxu0  ;;  %v2236_v26 = vpop.f32.mrf.mxu1 }
 0x291   : > { %v2186_v45 = vpop.f32.mrf.mxu2  ;;  %v2188_v46 = vpop.f32.mrf.mxu3 }
 0x299   : > { %v2190_v47 = vpop.f32.mrf.mxu2  ;;  %v2192_v48 = vpop.f32.mrf.mxu3 }
 0x2a1   : > { %v2194_v49 = vpop.f32.mrf.mxu2  ;;  %v2196_v50 = vpop.f32.mrf.mxu3 }
 0x2a9   : > { %v807_v51 = vpop.f32.mrf.mxu2  ;;  %v872_v52 = vpop.f32.mrf.mxu3 }
 0x2b1   : > { %v2198_v53 = vpop.f32.mrf.mxu2  ;;  %v2200_v54 = vpop.f32.mrf.mxu3 }
 0x2b9   : > { %v813_v56 = vpop.f32.mrf.mxu2  ;;  %v878_v57 = vpop.f32.mrf.mxu3 }
 0x2ba   : > { %v2239_v28 = vadd.f32 %v813_v56, %v674_v20  ;;  %v2241_v29 = vadd.f32 %v878_v57, %v675_v21  ;;  %v2254_v56 = vadd.f32 %v807_v51, %v670_v35  ;;  %v2256_v57 = vadd.f32 %v872_v52, %v671_v36 }
 0x2bb   : > { %v667_v51 = vunpack.c.h.bf16 %v645_v44 }
 0x2bc   : > { %v926_v40 = vmax.f32 %v2239_v28, %v2241_v29  ;;  %v920_v16 = vmax.f32 %v2254_v56, %v2256_v57 }
 0x2bd   : > { %v2278_v21 = vadd.f32 %v2192_v48, %v667_v51  ;;  %v644_v51 = vld [vmem:[%s2114_s22 + $0x20] sm:$0xff] }
 0x2c1   : > { %v2204_v58 = vpop.f32.mrf.mxu2  ;;  %v2206_v59 = vpop.f32.mrf.mxu3 }
 0x2c9   : > { %v819_v61 = vpop.f32.mrf.mxu2  ;;  %v884_v62 = vpop.f32.mrf.mxu3 }
 0x2ca   : > { %v2226_v14 = vadd.f32 %v819_v61, %v678_v9  ;;  %v2228_v15 = vadd.f32 %v884_v62, %v679_v10  ;;  %v650_v61 = vld [vmem:[%s2114_s22 + $0x50] sm:$0xff]  ;;  %v857_v9 = vpop.f32.mrf.mxu1  ;;  %v666_v10 = vunpack.c.l.bf16 %v645_v44 }
 0x2cb   : > { %v677_v52 = vunpack.c.h.bf16 %v650_v61 }
 0x2cc   : > { %v932_v22 = vmax.f32 %v2226_v14, %v2228_v15  ;;  %v2275_v20 = vadd.f32 %v2190_v47, %v666_v10 }
 0x2ce   : > { %v914_v35 = vmax.f32 %v2275_v20, %v2278_v21 }
 0x2d1   : > { %v822_v5 = vpop.f32.mrf.mxu2  ;;  %v887_v6 = vpop.f32.mrf.mxu3 }
 0x2d2   : > { %v2216_v7 = vadd.f32 %v822_v5, %v680_v2  ;;  %v2218_v8 = vadd.f32 %v887_v6, %v681_v3  ;;  %v792_v6 = vpop.f32.mrf.mxu0  ;;  %v860_v36 = vpop.f32.mrf.mxu1 }
 0x2d4   : > { %v935_v11 = vmax.f32 %v2216_v7, %v2218_v8 }
 0x2d6   : > { %936 = vmax.xlane.f32.xlu2 %v935_v11  ;;  %v676_v11 = vunpack.c.l.bf16 %v650_v61 }
 0x2d9   : > { %v825_v17 = vpop.f32.mrf.mxu2  ;;  %v890_v18 = vpop.f32.mrf.mxu3 }
 0x2da   : > { %v2259_v62 = vadd.f32 %v825_v17, %v682_v38  ;;  %v2261_v63 = vadd.f32 %v890_v18, %v683_v39  ;;  %v795_v48 = vpop.f32.mrf.mxu0 }
 0x2db   : > { %v796_v37 = vadd.f32 %v795_v48, %v662_v27 }
 0x2dc   : > { %v938_v17 = vmax.f32 %v2259_v62, %v2261_v63 }
 0x2de   : > { %933 = vmax.xlane.f32.xlu2 %v932_v22  ;;  %v2281_v22 = vadd.f32 %v2204_v58, %v676_v11  ;;  %v641_v58 = vld [vmem:[%s2114_s22 + $0x8] sm:$0xff]  ;;  %v664_v11 = vunpack.c.l.bf16 %v644_v51 }
 0x2e1   : > { %v828_v31 = vpop.f32.mrf.mxu2  ;;  %v893_v32 = vpop.f32.mrf.mxu3 }
 0x2e2   : > { %v2244_v33 = vadd.f32 %v828_v31, %v684_v23  ;;  %v2246_v34 = vadd.f32 %v893_v32, %v685_v24  ;;  %v2284_v23 = vadd.f32 %v2206_v59, %v677_v52  ;;  %v648_v24 = vld [vmem:[%s2114_s22 + $0x40] sm:$0xff]  ;;  %v861_v59 = vadd.f32 %v860_v36, %v663_v30 }
 0x2e3   : > { %v672_v31 = vunpack.c.l.bf16 %v648_v24  ;;  %v673_v32 = vunpack.c.h.bf16 %v648_v24  ;;  %v665_v52 = vunpack.c.h.bf16 %v644_v51  ;;  %v640_v30 = vld [vmem:[%s2114_s22] sm:$0xff] }
 0x2e4   : > { %v941_v41 = vmax.f32 %v2244_v33, %v2246_v34  ;;  %v929_v47 = vmax.f32 %v2281_v22, %v2284_v23 }
 0x2e5   : > { %v2293_v38 = vadd.f32 %v2198_v53, %v672_v31  ;;  %v2296_v39 = vadd.f32 %v2200_v54, %v673_v32  ;;  %v656_v31 = vunpack.c.l.bf16 %v640_v30  ;;  %v657_v32 = vunpack.c.h.bf16 %v640_v30 }
 0x2e6   : > { %927 = vmax.xlane.f32.xlu2 %v926_v40  ;;  %942 = vmax.xlane.f32.xlu1 %v941_v41  ;;  %v646_v40 = vld [vmem:[%s2114_s22 + $0x30] sm:$0xff]  ;;  %v658_v41 = vunpack.c.l.bf16 %v641_v58 }
 0x2e7   : > { %v669_v44 = vunpack.c.h.bf16 %v646_v40  ;;  %v923_v61 = vmax.f32 %v2293_v38, %v2296_v39 }
 0x2e9   : > { %v831_v2 = vpop.f32.mrf.mxu2  ;;  %v896_v3 = vpop.f32.mrf.mxu3  ;;  %v2311_v10 = vadd.f32 %v2196_v50, %v669_v44 }
 0x2ea   : > { %v2263_v4 = vadd.f32 %v831_v2, %v686_v42  ;;  %v2265_v5 = vadd.f32 %v896_v3, %v687_v43  ;;  %v659_v42 = vunpack.c.h.bf16 %v641_v58  ;;  %v668_v43 = vunpack.c.l.bf16 %v646_v40 }
 0x2eb   : > { %v908_v2 = vmax.f32 %v796_v37, %v861_v59  ;;  %v2302_v3 = vadd.f32 %v2234_v25, %v658_v41 }
 0x2ec   : > { %v944_v18 = vmax.f32 %v2263_v4, %v2265_v5  ;;  %v2305_v53 = vadd.f32 %v2236_v26, %v659_v42  ;;  %v2308_v54 = vadd.f32 %v2194_v49, %v668_v43  ;;  %v799_v26 = vadd.f32 %v2186_v45, %v664_v11 }
 0x2ed   : > { %v864_v49 = vadd.f32 %v2188_v46, %v665_v52  ;;  %v2329_v45 = vadd.f32 %v2222_v12, %v656_v31  ;;  %v2332_v46 = vadd.f32 %v2224_v13, %v657_v32 }
 0x2ee   : > { %921 = vmax.xlane.f32.xlu2 %v920_v16  ;;  %939 = vmax.xlane.f32.xlu1 %v938_v17  ;;  %v917_v16 = vmax.f32 %v2308_v54, %v2311_v10  ;;  %v902_v25 = vmax.f32 %v2302_v3, %v2305_v53  ;;  %v642_v17 = vld [vmem:[%s2114_s22 + $0x10] sm:$0xff] }
 0x2ef   : > { %945 = vmax.xlane.f32.xlu0 %v944_v18  ;;  %v660_v18 = vunpack.c.l.bf16 %v642_v17  ;;  %v661_v50 = vunpack.c.h.bf16 %v642_v17  ;;  %v911_v19 = vmax.f32 %v799_v26, %v864_v49 }
 0x2f1   : > { %v2321_v24 = vadd.f32 %v792_v6, %v660_v18  ;;  %v2323_v27 = vadd.f32 %v857_v9, %v661_v50 }
 0x2f6   : > { %915 = vmax.xlane.f32.xlu2 %v914_v35  ;;  %930 = vmax.xlane.f32.xlu1 %v929_v47  ;;  %v905_v35 = vmax.f32 %v2321_v24, %v2323_v27  ;;  %v899_v47 = vmax.f32 %v2329_v45, %v2332_v46 }
 0x2fe   : > { %924 = vmax.xlane.f32.xlu1 %v923_v61  ;;  %909 = vmax.xlane.f32.xlu2 %v908_v2 }
 0x306   : > { %918 = vmax.xlane.f32.xlu1 %v917_v16  ;;  %903 = vmax.xlane.f32.xlu2 %v902_v25 }
 0x30e   : > { %912 = vmax.xlane.f32.xlu1 %v911_v19 }
 0x316   : > { %906 = vmax.xlane.f32.xlu1 %v905_v35 }
 0x31e   : > { %900 = vmax.xlane.f32.xlu1 %v899_v47 }
 0x349   : > { %v2336_v6 = vpop.xlane.xlu2 %936 }
 0x351   : > { %v2338_v9 = vpop.xlane.xlu2 %933 }
 0x359   : > { %v928_v48 = vpop.xlane.xlu2 %927  ;;  %v2340_v36 = vpop.xlane.xlu1 %942 }
 0x361   : > { %v922_v58 = vpop.xlane.xlu2 %921  ;;  %v2342_v40 = vpop.xlane.xlu1 %939 }
 0x362   : > { %v961_v17 = vsub.f32 %v2254_v56, %v922_v58  ;;  %v962_v18 = vsub.f32 %v2256_v57, %v922_v58 }
 0x369   : > { %v916_v41 = vpop.xlane.xlu2 %915  ;;  %v2344_v12 = vpop.xlane.xlu1 %930 }
 0x36a   : > { %v957_v51 = vsub.f32 %v2275_v20, %v916_v41  ;;  %v958_v11 = vsub.f32 %v2278_v21, %v916_v41  ;;  %v1009_v21 = vmul.f32 1.442695, %v962_v18  ;;  %v965_v41 = vsub.f32 %v2239_v28, %v928_v48 }
 0x36c   : > { %v999_v16 = vmul.f32 1.442695, %v957_v51  ;;  %v1001_v25 = vmul.f32 1.442695, %v958_v11 }
 0x371   : > { %v925_v42 = vpop.xlane.xlu1 %924  ;;  %v910_v13 = vpop.xlane.xlu2 %909 }
 0x372   : > { %v953_v43 = vsub.f32 %v796_v37, %v910_v13  ;;  %v954_v44 = vsub.f32 %v861_v59, %v910_v13  ;;  %v1007_v59 = vmul.f32 1.442695, %v961_v17  ;;  %v966_v13 = vsub.f32 %v2241_v29, %v928_v48 }
 0x373   : > { %v963_v28 = vsub.f32 %v2293_v38, %v925_v42  ;;  %v964_v29 = vsub.f32 %v2296_v39, %v925_v42  ;;  %v969_v48 = vsub.f32 %v2226_v14, %v2338_v9 }
 0x374   : > { %v991_v61 = vmul.f32 1.442695, %v953_v43  ;;  %v993_v2 = vmul.f32 1.442695, %v954_v44 }
 0x375   : > { %v1023_v39 = vmul.f32 1.442695, %v969_v48  ;;  %v976_v48 = vsub.f32 %v2246_v34, %v2340_v36 }
 0x376   : > { %1821 = vpow2.f32 %v991_v61 }
 0x377   : > { %1823 = vpow2.f32 %v993_v2  ;;  %v1017_v2 = vmul.f32 1.442695, %v966_v13 }
 0x378   : > { %1825 = vpow2.f32 %v999_v16  ;;  %v1011_v16 = vmul.f32 1.442695, %v963_v28 }
 0x379   : > { %v919_v52 = vpop.xlane.xlu1 %918  ;;  %1827 = vpow2.f32 %v1001_v25  ;;  %v1013_v25 = vmul.f32 1.442695, %v964_v29 }
 0x37a   : > { %1829 = vpow2.f32 %v1007_v59  ;;  %v959_v56 = vsub.f32 %v2308_v54, %v919_v52  ;;  %v960_v58 = vsub.f32 %v2311_v10, %v919_v52  ;;  %v1015_v54 = vmul.f32 1.442695, %v965_v41 }
 0x37b   : > { %1831 = vpow2.f32 %v1009_v21  ;;  %v970_v52 = vsub.f32 %v2228_v15, %v2338_v9  ;;  %v967_v59 = vsub.f32 %v2281_v22, %v2344_v12  ;;  %v968_v9 = vsub.f32 %v2284_v23, %v2344_v12 }
 0x37c   : > { %v2350_v50 = vpop.eup %1821  ;;  %v1005_v43 = vmul.f32 1.442695, %v960_v58  ;;  %v971_v58 = vsub.f32 %v2216_v7, %v2336_v6 }
 0x37d   : > { %2713 = vst [vmem:[#allocation15_spill] sm:$0xff] %v2350_v50  ;;  %v2352_v37 = vpop.eup %1823  ;;  %v1025_v14 = vmul.f32 1.442695, %v970_v52 }
 0x37e   : > { %2714 = vst [vmem:[#allocation16_spill] sm:$0xff] %v2352_v37  ;;  %v1052_v20 = vadd.f32 %v2352_v37, %v2350_v50  ;;  %v2356_v32 = vpop.eup %1825 }
 0x37f   : > { %v2359_v47 = vpop.eup %1827 }
 0x380   : > { %1053 = vadd.xlane.f32.xlu2 %v1052_v20  ;;  %v2366_v44 = vpop.eup %1829  ;;  %v973_v20 = vsub.f32 %v2259_v62, %v2342_v40 }
 0x381   : > { %v913_v19 = vpop.xlane.xlu1 %912  ;;  %v2368_v61 = vpop.eup %1831 }
 0x382   : > { %v955_v30 = vsub.f32 %v799_v26, %v913_v19  ;;  %v956_v31 = vsub.f32 %v864_v49, %v913_v19  ;;  %v1003_v26 = vmul.f32 1.442695, %v959_v56  ;;  %v1058_v49 = vadd.f32 %v2359_v47, %v2356_v32 }
 0x383   : > { %v1064_v38 = vadd.f32 %v2368_v61, %v2366_v44  ;;  %v974_v19 = vsub.f32 %v2261_v63, %v2342_v40  ;;  %v1031_v23 = vmul.f32 1.442695, %v973_v20  ;;  %v972_v40 = vsub.f32 %v2218_v8, %v2336_v6 }
 0x384   : > { %v995_v57 = vmul.f32 1.442695, %v955_v30  ;;  %v997_v35 = vmul.f32 1.442695, %v956_v31  ;;  %v1019_v30 = vmul.f32 1.442695, %v967_v59 }
 0x385   : > { %v1021_v31 = vmul.f32 1.442695, %v968_v9  ;;  %v1033_v62 = vmul.f32 1.442695, %v974_v19 }
 0x386   : > { %1833 = vpow2.f32 %v995_v57  ;;  %v946_v57 = vpop.xlane.xlu0 %945 }
 0x387   : > { %1835 = vpow2.f32 %v997_v35  ;;  %v977_v41 = vsub.f32 %v2263_v4, %v946_v57  ;;  %v904_v4 = vpop.xlane.xlu2 %903 }
 0x388   : > { %1059 = vadd.xlane.f32.xlu2 %v1058_v49  ;;  %1837 = vpow2.f32 %v1003_v26  ;;  %v978_v26 = vsub.f32 %v2265_v5, %v946_v57  ;;  %v1027_v49 = vmul.f32 1.442695, %v971_v58  ;;  %v975_v5 = vsub.f32 %v2244_v33, %v2340_v36 }
 0x389   : > { %1839 = vpow2.f32 %v1005_v43  ;;  %v1029_v43 = vmul.f32 1.442695, %v972_v40 }
 0x38a   : > { %1841 = vpow2.f32 %v1015_v54  ;;  %v1041_v6 = vmul.f32 1.442695, %v978_v26 }
 0x38b   : > { %1843 = vpow2.f32 %v1017_v2  ;;  %v1039_v2 = vmul.f32 1.442695, %v977_v41 }
 0x38c   : > { %v2370_v51 = vpop.eup %1833  ;;  %1845 = vpow2.f32 %v1011_v16  ;;  %v950_v16 = vsub.f32 %v2305_v53, %v904_v4 }
 0x38d   : > { %2715 = vst [vmem:[#allocation17_spill] sm:$0xff] %v2370_v51  ;;  %v2373_v10 = vpop.eup %1835  ;;  %1847 = vpow2.f32 %v1013_v25  ;;  %v1035_v25 = vmul.f32 1.442695, %v975_v5  ;;  %v575_v5 = vld [vmem:[%s2687_s5 + $0x10] sm:$0xff] }
 0x38e   : > { %2716 = vst [vmem:[#allocation18_spill] sm:$0xff] %v2373_v10  ;;  %v1055_v11 = vadd.f32 %v2373_v10, %v2370_v51  ;;  %v2384_v17 = vpop.eup %1837  ;;  %1849 = vpow2.f32 %v1023_v39  ;;  %v1037_v39 = vmul.f32 1.442695, %v976_v48  ;;  %v985_v59 = vmul.f32 1.442695, %v950_v16  ;;  %v574_v48 = vld [vmem:[%s2687_s5 + $0x8] sm:$0xff] }
 0x38f   : > { %v2386_v42 = vpop.eup %1839  ;;  %1851 = vpow2.f32 %v1025_v14  ;;  %v1978_v14 = vmov 0  }
 0x390   : > { %1056 = vadd.xlane.f32.xlu1 %v1055_v11  ;;  %1065 = vadd.xlane.f32.xlu2 %v1064_v38  ;;  %v2388_v18 = vpop.eup %1841  ;;  %v1061_v21 = vadd.f32 %v2386_v42, %v2384_v17  ;;  %1853 = vpow2.f32 %v1019_v30  ;;  %v949_v11 = vsub.f32 %v2302_v3, %v904_v4  ;;  %v907_v38 = vpop.xlane.xlu1 %906  ;;  %v573_v4 = vld [vmem:[%s2687_s5] sm:$0xff] }
 0x391   : > { %v2392_v15 = vpop.eup %1843  ;;  %1855 = vpow2.f32 %v1021_v31  ;;  %1818 = vset.pattern.permute.xlu2 %v1978_v14  ;;  %1819 = vset.pattern.permute.xlu1 %v1978_v14  ;;  %v951_v53 = vsub.f32 %v2321_v24, %v907_v38 }
 0x392   : > { %v1070_v22 = vadd.f32 %v2392_v15, %v2388_v18  ;;  %v2404_v56 = vpop.eup %1845  ;;  %1857 = vpow2.f32 %v1031_v23  ;;  %v983_v36 = vmul.f32 1.442695, %v949_v11  ;;  %1820 = vset.pattern.permute.xlu0 %v1978_v14  ;;  %v576_v11 = vld [vmem:[%s2687_s5 + $0x18] sm:$0xff] }
 0x393   : > { %v2406_v12 = vpop.eup %1847  ;;  %1859 = vpow2.f32 %v1033_v62  ;;  %v987_v30 = vmul.f32 1.442695, %v951_v53 }
 0x394   : > { %v2408_v35 = vpop.eup %1849  ;;  %v1067_v13 = vadd.f32 %v2406_v12, %v2404_v56  ;;  %1861 = vpow2.f32 %v1027_v49 }
 0x395   : > { %v2412_v63 = vpop.eup %1851  ;;  %1863 = vpow2.f32 %v1029_v43 }
 0x396   : > { %v1076_v7 = vadd.f32 %v2412_v63, %v2408_v35  ;;  %v2422_v54 = vpop.eup %1853  ;;  %1865 = vpow2.f32 %v1039_v2 }
 0x397   : > { %v2424_v8 = vpop.eup %1855  ;;  %1867 = vpow2.f32 %v1041_v6 }
 0x398   : > { %1062 = vadd.xlane.f32.xlu1 %v1061_v21  ;;  %1071 = vadd.xlane.f32.xlu2 %v1070_v22  ;;  %v2426_v28 = vpop.eup %1857  ;;  %v1073_v52 = vadd.f32 %v2424_v8, %v2422_v54  ;;  %1869 = vpow2.f32 %v1035_v25  ;;  %v952_v21 = vsub.f32 %v2323_v27, %v907_v38  ;;  %v901_v23 = vpop.xlane.xlu1 %900 }
 0x399   : > { %v2430_v29 = vpop.eup %1859  ;;  %1871 = vpow2.f32 %v1037_v39  ;;  %v947_v27 = vsub.f32 %v2329_v45, %v901_v23  ;;  %v948_v40 = vsub.f32 %v2332_v46, %v901_v23 }
 0x39a   : > { %v1082_v33 = vadd.f32 %v2430_v29, %v2426_v28  ;;  %v2440_v34 = vpop.eup %1861  ;;  %1873 = vpow2.f32 %v983_v36  ;;  %v989_v31 = vmul.f32 1.442695, %v952_v21 }
 0x39b   : > { %v2442_v3 = vpop.eup %1863  ;;  %1875 = vpow2.f32 %v985_v59  ;;  %v981_v49 = vmul.f32 1.442695, %v948_v40 }
 0x39c   : > { %v2444_v9 = vpop.eup %1865  ;;  %v1079_v19 = vadd.f32 %v2442_v3, %v2440_v34  ;;  %1877 = vpow2.f32 %v987_v30 }
 0x39d   : > { %v2447_v20 = vpop.eup %1867  ;;  %1879 = vpow2.f32 %v989_v31 }
 0x39e   : > { %v1088_v22 = vadd.f32 %v2447_v20, %v2444_v9  ;;  %v2454_v62 = vpop.eup %1869 }
 0x39f   : > { %v2456_v24 = vpop.eup %1871 }
 0x3a0   : > { %1068 = vadd.xlane.f32.xlu1 %v1067_v13  ;;  %1077 = vadd.xlane.f32.xlu2 %v1076_v7  ;;  %v2458_v57 = vpop.eup %1873  ;;  %v1085_v41 = vadd.f32 %v2456_v24, %v2454_v62  ;;  %v979_v13 = vmul.f32 1.442695, %v947_v27 }
 0x3a1   : > { %v2461_v58 = vpop.eup %1875 }
 0x3a2   : > { %v1046_v26 = vadd.f32 %v2461_v58, %v2458_v57  ;;  %v2468_v7 = vpop.eup %1877  ;;  %1881 = vpow2.f32 %v979_v13 }
 0x3a3   : > { %v2470_v43 = vpop.eup %1879  ;;  %1883 = vpow2.f32 %v981_v49 }
 0x3a4   : > { %v1049_v45 = vadd.f32 %v2470_v43, %v2468_v7 }
 0x3a8   : > { %1074 = vadd.xlane.f32.xlu1 %v1073_v52  ;;  %1083 = vadd.xlane.f32.xlu2 %v1082_v33  ;;  %v2474_v46 = vpop.eup %1881 }
 0x3a9   : > { %v2476_v2 = vpop.eup %1883 }
 0x3aa   : > { %v1043_v6 = vadd.f32 %v2476_v2, %v2474_v46 }
 0x3b0   : > { %1080 = vadd.xlane.f32.xlu1 %v1079_v19  ;;  %1089 = vadd.xlane.f32.xlu2 %v1088_v22 }
 0x3b8   : > { %1086 = vadd.xlane.f32.xlu1 %v1085_v41  ;;  %1047 = vadd.xlane.f32.xlu2 %v1046_v26 }
 0x3c0   : > { %1050 = vadd.xlane.f32.xlu1 %v1049_v45 }
 0x3c8   : > { %1044 = vadd.xlane.f32.xlu1 %v1043_v6 }
 0x3d0   : > { %579 = vperm.xlu2 %1818, %v573_v4  }
 0x3d8   : > { %589 = vperm.xlu2 %1818, %v575_v5  }
 0x3e0   : > { %594 = vperm.xlu2 %1818, %v576_v11  }
 0x3e1   : > { %584 = vperm.xlu1 %1819, %v574_v48  }
 0x3f3   : > { %v2492_v52 = vpop.xlane.xlu2 %1053 }
 0x3fb   : > { %v2494_v16 = vpop.xlane.xlu2 %1059 }
 0x403   : > { %v2496_v38 = vpop.xlane.xlu1 %1056  ;;  %v2498_v25 = vpop.xlane.xlu2 %1065 }
 0x40b   : > { %v2500_v33 = vpop.xlane.xlu1 %1062  ;;  %v1072_v39 = vpop.xlane.xlu2 %1071 }
 0x413   : > { %v1069_v14 = vpop.xlane.xlu1 %1068  ;;  %v1078_v36 = vpop.xlane.xlu2 %1077 }
 0x41b   : > { %v1075_v59 = vpop.xlane.xlu1 %1074  ;;  %v1084_v53 = vpop.xlane.xlu2 %1083 }
 0x41c   : > { %1885 = vrcp.f32 %v1084_v53 }
 0x422   : > { %v1886_v30 = vpop.eup %1885 }
 0x423   : > { %v1081_v21 = vpop.xlane.xlu1 %1080  ;;  %v1090_v19 = vpop.xlane.xlu2 %1089  ;;  %v1120_v40 = vmul.f32 %v1886_v30, %v1084_v53 }
 0x424   : > { %1887 = vrcp.f32 %v1090_v19 }
 0x425   : > { %1889 = vrcp.f32 %v1081_v21  ;;  %v1136_v48 = vsub.f32 2.0, %v1120_v40 }
 0x426   : > { %1891 = vrcp.f32 %v1078_v36 }
 0x427   : > { %1893 = vrcp.f32 %v1075_v59  ;;  %v1152_v40 = vmul.f32 %v1886_v30, %v1136_v48 }
 0x429   : > { %v2527_v30 = vmul.f32 %v2426_v28, %v1152_v40 }
 0x42a   : > { %v1888_v31 = vpop.eup %1887 }
 0x42b   : > { %v1087_v22 = vpop.xlane.xlu1 %1086  ;;  %v1122_v23 = vmul.f32 %v1888_v31, %v1090_v19  ;;  %v1890_v27 = vpop.eup %1889 }
 0x42c   : > { %1895 = vrcp.f32 %v1087_v22  ;;  %v1892_v41 = vpop.eup %1891  ;;  %v1048_v26 = vpop.xlane.xlu2 %1047  ;;  %v1119_v6 = vmul.f32 %v1890_v27, %v1081_v21 }
 0x42d   : > { %1897 = vrcp.f32 %v1072_v39  ;;  %v1138_v13 = vsub.f32 2.0, %v1122_v23  ;;  %v1894_v49 = vpop.eup %1893  ;;  %v1118_v5 = vmul.f32 %v1892_v41, %v1078_v36 }
 0x42e   : > { %1899 = vrcp.f32 %v1069_v14  ;;  %v1135_v21 = vsub.f32 2.0, %v1119_v6 }
 0x42f   : > { %1901 = vrcp.f32 %v2492_v52  ;;  %v1154_v45 = vmul.f32 %v1888_v31, %v1138_v13  ;;  %v1117_v31 = vmul.f32 %v1894_v49, %v1075_v59 }
 0x430   : > { %1903 = vrcp.f32 %v2498_v25  ;;  %v1151_v6 = vmul.f32 %v1890_v27, %v1135_v21 }
 0x431   : > { %1905 = vrcp.f32 %v2500_v33  ;;  %v2506_v11 = vmul.f32 %v2444_v9, %v1154_v45  ;;  %v2509_v53 = vmul.f32 %v2447_v20, %v1154_v45  ;;  %v1133_v59 = vsub.f32 2.0, %v1117_v31 }
 0x432   : > { %v1896_v4 = vpop.eup %1895  ;;  %1907 = vrcp.f32 %v1048_v26  ;;  %v2539_v28 = vmul.f32 %v2442_v3, %v1151_v6 }
 0x433   : > { %2717 = vst [vmem:[#allocation19_spill] sm:$0xff] %v2506_v11  ;;  %v1121_v19 = vmul.f32 %v1896_v4, %v1087_v22  ;;  %v1051_v23 = vpop.xlane.xlu1 %1050  ;;  %v1898_v1 = vpop.eup %1897  ;;  %1909 = vrcp.f32 %v2494_v16  ;;  %1250 = vmatpush.msrb.mxu0 %v2506_v11  ;;  %1279 = vmatpush.msra.mxu1 %v2509_v53  ;;  %v1134_v22 = vsub.f32 2.0, %v1118_v5  ;;  %v1149_v5 = vmul.f32 %v1894_v49, %v1133_v59 }
 0x434   : > { %2718 = vst [vmem:[#allocation20_spill] sm:$0xff] %v2509_v53  ;;  %v1900_v60 = vpop.eup %1899  ;;  %1911 = vrcp.f32 %v1051_v23  ;;  %v1116_v36 = vmul.f32 %v1898_v1, %v1072_v39 }
 0x435   : > { %v1137_v13 = vsub.f32 2.0, %v1121_v19  ;;  %v2514_v9 = vpop.eup %1901  ;;  %1913 = vrcp.f32 %v2496_v38  ;;  %v1115_v0 = vmul.f32 %v1900_v60, %v1069_v14  ;;  %v1150_v39 = vmul.f32 %v1892_v41, %v1134_v22 }
 0x436   : > { %v1904_v20 = vpop.eup %1903  ;;  %v1132_v51 = vsub.f32 2.0, %v1116_v36  ;;  %v2536_v41 = vmul.f32 %v2440_v34, %v1151_v6 }
 0x437   : > { %v1153_v45 = vmul.f32 %v1896_v4, %v1137_v13  ;;  %v1906_v55 = vpop.eup %1905  ;;  %v1114_v37 = vmul.f32 %v1904_v20, %v2498_v25  ;;  %v1131_v25 = vsub.f32 2.0, %v1115_v0  ;;  %v2547_v0 = vmul.f32 %v2408_v35, %v1150_v39 }
 0x438   : > { %v1908_v10 = vpop.eup %1907  ;;  %v1148_v31 = vmul.f32 %v1898_v1, %v1132_v51  ;;  %v2550_v34 = vmul.f32 %v2412_v63, %v1150_v39  ;;  %v2556_v1 = vmul.f32 %v2422_v54, %v1149_v5 }
 0x439   : > { %v2518_v19 = vmul.f32 %v2454_v62, %v1153_v45  ;;  %v2521_v53 = vmul.f32 %v2456_v24, %v1153_v45  ;;  %v1910_v11 = vpop.eup %1909  ;;  %v2530_v62 = vmul.f32 %v2430_v29, %v1152_v40  ;;  %v1113_v24 = vmul.f32 %v1906_v55, %v2500_v33 }
 0x43a   : > { %v1912_v50 = vpop.eup %1911  ;;  %v1108_v4 = vmul.f32 %v1908_v10, %v1048_v26  ;;  %v1110_v29 = vmul.f32 %v2514_v9, %v2492_v52  ;;  %v1112_v48 = vmul.f32 %v1910_v11, %v2494_v16  ;;  %v1130_v33 = vsub.f32 2.0, %v1114_v37 }
 0x43b   : > { %1251 = vmatpush.msrb.mxu0 %v2518_v19  ;;  %1280 = vmatpush.msra.mxu1 %v2521_v53  ;;  %v1045_v14 = vpop.xlane.xlu1 %1044  ;;  %v1914_v27 = vpop.eup %1913  ;;  %v1109_v26 = vmul.f32 %v1912_v50, %v1051_v23  ;;  %v1129_v49 = vsub.f32 2.0, %v1113_v24  ;;  %v1147_v52 = vmul.f32 %v1900_v60, %v1131_v25  ;;  %v2559_v37 = vmul.f32 %v2424_v8, %v1149_v5  ;;  %v2721_v25 = vld [vmem:[#allocation16_spill] sm:$0xff] }
 0x43c   : > { %1915 = vrcp.f32 %v1045_v14  ;;  %v1111_v3 = vmul.f32 %v1914_v27, %v2496_v38  ;;  %v1124_v21 = vsub.f32 2.0, %v1108_v4  ;;  %v1126_v35 = vsub.f32 2.0, %v1110_v29  ;;  %v2720_v4 = vld [vmem:[#allocation15_spill] sm:$0xff] }
 0x43d   : > { %1252 = vmatpush.msrb.mxu0 %v2527_v30  ;;  %1281 = vmatpush.msra.mxu1 %v2530_v62  ;;  %v1128_v16 = vsub.f32 2.0, %v1112_v48  ;;  %v1146_v63 = vmul.f32 %v1904_v20, %v1130_v33  ;;  %v1125_v23 = vsub.f32 2.0, %v1109_v26  ;;  %v2564_v60 = vmul.f32 %v2388_v18, %v1148_v31  ;;  %v580_v33 = vpop.permute.xlu2 %579 }
 0x43e   : > { %v2567_v38 = vmul.f32 %v2392_v15, %v1148_v31  ;;  %v1127_v54 = vsub.f32 2.0, %v1111_v3  ;;  %v1145_v36 = vmul.f32 %v1906_v55, %v1129_v49  ;;  %v1140_v8 = vmul.f32 %v1908_v10, %v1124_v21  ;;  %v2723_v21 = vld [vmem:[#allocation13_spill] sm:$0xff] }
 0x43f   : > { %1253 = vmatpush.msrb.mxu0 %v2536_v41  ;;  %1282 = vmatpush.msra.mxu1 %v2539_v28  ;;  %v1171_v20 = vmul.f32 %v2404_v56, %v1147_v52  ;;  %v1172_v40 = vmul.f32 %v2406_v12, %v1147_v52  ;;  %v1142_v45 = vmul.f32 %v2514_v9, %v1126_v35 }
 0x440   : > { %v1144_v59 = vmul.f32 %v1910_v11, %v1128_v16  ;;  %v1141_v18 = vmul.f32 %v1912_v50, %v1125_v23  ;;  %v1169_v15 = vmul.f32 %v2366_v44, %v1146_v63  ;;  %v1170_v55 = vmul.f32 %v2368_v61, %v1146_v63 }
 0x441   : > { %1254 = vmatpush.msrb.mxu0 %v2547_v0  ;;  %1283 = vmatpush.msra.mxu1 %v2550_v34  ;;  %v1143_v10 = vmul.f32 %v1914_v27, %v1127_v54  ;;  %v1167_v39 = vmul.f32 %v2384_v17, %v1145_v36  ;;  %v1157_v56 = vmul.f32 %v2458_v57, %v1140_v8  ;;  %v2719_v27 = vld [vmem:[#allocation17_spill] sm:$0xff] }
 0x442   : > { %v1916_v51 = vpop.eup %1915  ;;  %v1158_v12 = vmul.f32 %v2461_v58, %v1140_v8  ;;  %v1165_v9 = vmul.f32 %v2356_v32, %v1144_v59  ;;  %v1166_v44 = vmul.f32 %v2359_v47, %v1144_v59  ;;  %v1159_v61 = vmul.f32 %v2468_v7, %v1141_v18 }
 0x443   : > { %v1107_v13 = vmul.f32 %v1916_v51, %v1045_v14  ;;  %1255 = vmatpush.msrb.mxu0 %v2556_v1  ;;  %1284 = vmatpush.msra.mxu1 %v2559_v37  ;;  %v1168_v14 = vmul.f32 %v2386_v42, %v1145_v36  ;;  %v1160_v17 = vmul.f32 %v2470_v43, %v1141_v18 }
 0x444   : > { %v1163_v24 = vmul.f32 %v2719_v27, %v1143_v10  ;;  %v1161_v58 = vmul.f32 %v2720_v4, %v1142_v45  ;;  %v627_v52 = vadd.f32 %v2723_v21, %v580_v33 }
 0x445   : > { %v1123_v22 = vsub.f32 2.0, %v1107_v13  ;;  %1256 = vmatpush.msrb.mxu0 %v2564_v60  ;;  %1285 = vmatpush.msra.mxu1 %v2567_v38 }
 0x447   : > { %v1139_v6 = vmul.f32 %v1916_v51, %v1123_v22  ;;  %1257 = vmatpush.msrb.mxu0 %v1171_v20  ;;  %1286 = vmatpush.msra.mxu1 %v1172_v40  ;;  %v2724_v22 = vld [vmem:[#allocation11_spill] sm:$0xff] }
 0x449   : > { %1258 = vmatpush.msrb.mxu0 %v1169_v15  ;;  %1287 = vmatpush.msra.mxu1 %v1170_v55  ;;  %v1155_v50 = vmul.f32 %v2474_v46, %v1139_v6  ;;  %v1156_v11 = vmul.f32 %v2476_v2, %v1139_v6  ;;  %v1162_v46 = vmul.f32 %v2721_v25, %v1142_v45  ;;  %v2722_v2 = vld [vmem:[#allocation18_spill] sm:$0xff]  ;;  %v590_v6 = vpop.permute.xlu2 %589  ;;  %v1243_v25 = vld [vmem:[#allocation3 + $0x10] sm:$0xff] }
 0x44a   : > { %v1164_v32 = vmul.f32 %v2722_v2, %v1143_v10 }
 0x44b   : > { %1259 = vmatpush.msrb.mxu0 %v1167_v39  ;;  %1288 = vmatpush.msra.mxu1 %v1168_v14  ;;  %v1188_v42 = vadd.f32 %v1157_v56, %v1155_v50  ;;  %v1209_v57 = vadd.f32 %v1158_v12, %v1156_v11 }
 0x44d   : > { %1260 = vmatpush.msrb.mxu0 %v1165_v9  ;;  %1289 = vmatpush.msra.mxu1 %v1166_v44  ;;  %v1189_v5 = vadd.f32 %v1188_v42, %v1159_v61  ;;  %v1210_v47 = vadd.f32 %v1209_v57, %v1160_v17  ;;  %v1187_v57 = vld [vmem:[#allocation4] sm:$0x3] }
 0x44f   : > { %1261 = vmatpush.msrb.mxu0 %v1163_v24  ;;  %1290 = vmatpush.msra.mxu1 %v1164_v32  ;;  %v1190_v7 = vadd.f32 %v1189_v5, %v1161_v58  ;;  %v1211_v29 = vadd.f32 %v1210_v47, %v1162_v46  ;;  %v1244_v47 = vld [vmem:[#allocation3 + $0x8] sm:$0xff] }
 0x451   : > { %1262 = vmatpush.msrb.mxu0 %v1161_v58  ;;  %1291 = vmatpush.msra.mxu1 %v1162_v46  ;;  %v1191_v43 = vadd.f32 %v1190_v7, %v1163_v24  ;;  %v1212_v48 = vadd.f32 %v1211_v29, %v1164_v32  ;;  %v1242_v58 = vld [vmem:[#allocation3 + $0x28] sm:$0xff]  ;;  %v1245_v7 = vld [vmem:[#allocation3 + $0x18] sm:$0xff] }
 0x453   : > { %1263 = vmatpush.msrb.mxu0 %v1159_v61  ;;  %1292 = vmatpush.msra.mxu1 %v1160_v17  ;;  %v1192_v26 = vadd.f32 %v1191_v43, %v1165_v9  ;;  %v1213_v31 = vadd.f32 %v1212_v48, %v1166_v44  ;;  %v585_v23 = vpop.permute.xlu1 %584  ;;  %v1237_v17 = vlaneseq }
 0x454   : > { %v630_v45 = vadd.f32 %v2724_v22, %v585_v23 }
 0x455   : > { %1264 = vmatpush.msrb.mxu0 %v1157_v56  ;;  %1293 = vmatpush.msra.mxu1 %v1158_v12  ;;  %v1193_v3 = vadd.f32 %v1192_v26, %v1167_v39  ;;  %v1214_v49 = vadd.f32 %v1213_v31, %v1168_v14  ;;  %v595_v56 = vpop.permute.xlu2 %594  ;;  %vm1239_vm5 = vcmp.lt.s32.totalorder %v1237_v17, 256  ;;  %v1246_v26 = vld [vmem:[#allocation3 + $0x20] sm:$0xff]  ;;  %v1247_v31 = vld [vmem:[#allocation3 + $0x38] sm:$0xff] }
 0x457   : > { %v1194_v51 = vadd.f32 %v1193_v3, %v1169_v15  ;;  %1265 = vmatpush.msrb.mxu0 %v1155_v50  ;;  %v1215_v35 = vadd.f32 %v1214_v49, %v1170_v55  ;;  %1294 = vmatpush.msra.mxu1 %v1156_v11  ;;  %v2725_v15 = vld [vmem:[#allocation12_spill] sm:$0xff] }
 0x458   : > { %1266 = vmatmul.f32.vlgmr.msrb.gmra.mxu0 %v627_v52  ;;  %1295 = vmatmul.f32.vlgmr.msra.gmra.mxu1 %v627_v52  ;;  %v633_v55 = vadd.f32 %v2725_v15, %v590_v6 }
 0x459   : > { %v1195_v16 = vadd.f32 %v1194_v51, %v1171_v20  ;;  %v1216_v63 = vadd.f32 %v1215_v35, %v1172_v40  ;;  %v1248_v51 = vld [vmem:[#allocation3 + $0x30] sm:$0xff]  ;;  %v1249_v35 = vld [vmem:[#allocation3] sm:$0xff] }
 0x45b   : > { %v1196_v13 = vadd.f32 %v1195_v16, %v2564_v60  ;;  %v1217_v54 = vadd.f32 %v1216_v63, %v2567_v38 }
 0x45d   : > { %v1197_v36 = vadd.f32 %v1196_v13, %v2556_v1  ;;  %v1218_v8 = vadd.f32 %v1217_v54, %v2559_v37 }
 0x45f   : > { %v1198_v59 = vadd.f32 %v1197_v36, %v2547_v0  ;;  %v1219_v18 = vadd.f32 %v1218_v8, %v2550_v34  ;;  %v2726_v0 = vld [vmem:[#allocation19_spill] sm:$0xff]  ;;  %v2727_v34 = vld [vmem:[#allocation20_spill] sm:$0xff] }
 0x460   : > { %1269 = vmatmul.f32.gmra.mxu0 %v630_v45  ;;  %1298 = vmatmul.f32.gmra.mxu1 %v630_v45 }
 0x461   : > { %v1199_v20 = vadd.f32 %v1198_v59, %v2536_v41  ;;  %v1220_v40 = vadd.f32 %v1219_v18, %v2539_v28 }
 0x463   : > { %v1200_v60 = vadd.f32 %v1199_v20, %v2527_v30  ;;  %v1221_v38 = vadd.f32 %v1220_v40, %v2530_v62  ;;  %v2728_v62 = vld [vmem:[#allocation14_spill] sm:$0xff] }
 0x464   : > { %v636_v11 = vadd.f32 %v2728_v62, %v595_v56 }
 0x465   : > { %v1201_v1 = vadd.f32 %v1200_v60, %v2518_v19  ;;  %v1222_v37 = vadd.f32 %v1221_v38, %v2521_v53 }
 0x467   : > { %v1202_v10 = vadd.f32 %v1201_v1, %v2726_v0  ;;  %v1223_v39 = vadd.f32 %v1222_v37, %v2727_v34 }
 0x468   : > { %1272 = vmatmul.f32.gmra.mxu0 %v633_v55  ;;  %1301 = vmatmul.f32.gmra.mxu1 %v633_v55 }
 0x469   : > { %v1203_v14 = vrot.slane %v1202_v10, 4  ;;  %v1224_v41 = vrot.slane %v1223_v39, 4 }
 0x46b   : > { %v1204_v28 = vadd.f32 %v1203_v14, %v1202_v10  ;;  %v1225_v12 = vadd.f32 %v1224_v41, %v1223_v39 }
 0x46d   : > { %v1205_v30 = vrot.slane %v1204_v28, 2  ;;  %v1226_v50 = vrot.slane %v1225_v12, 2 }
 0x46f   : > { %v1206_v19 = vadd.f32 %v1205_v30, %v1204_v28  ;;  %v1227_v9 = vadd.f32 %v1226_v50, %v1225_v12 }
 0x470   : > { %1275 = vmatmul.f32.gmra.mxu0 %v636_v11  ;;  %1304 = vmatmul.f32.gmra.mxu1 %v636_v11 }
 0x471   : > { %v1207_v53 = vrot.slane %v1206_v19, 1  ;;  %v1228_v44 = vrot.slane %v1227_v9, 1 }
 0x473   : > { %v1229_v61 = vadd.f32 %v1228_v44, %v1227_v9  ;;  %v1208_v42 = vadd.f32 %v1207_v53, %v1206_v19 }
 0x475   : > { %v1232_v27 = vrot.slane %v1229_v61, 7 }
 0x477   : > { %v1234_v24 = vsel %vm1233_vm4, %v1208_v42, %v1232_v27 }
 0x478   : > { %v1236_v4 = vadd.f32 %v1234_v24, %v1187_v57 }
 0x47a   : > { %1241 = vst.msk [vmem:[#allocation4] sm:$0x3] %vm1239_vm5, %v1236_v4 }
 0x4d5   : > { %v1267_v46 = vpop.f32.mrf.mxu0  ;;  %v1296_v2 = vpop.f32.mrf.mxu1 }
 0x4d6   : > { %v1308_v32 = vadd.f32 %v1267_v46, %v1242_v58  ;;  %v1309_v5 = vadd.f32 %v1296_v2, %v1243_v25 }
 0x4d8   : > { %1316 = vst [vmem:[#allocation3 + $0x28] sm:$0xff] %v1308_v32 }
 0x4d9   : > { %1317 = vst [vmem:[#allocation3 + $0x10] sm:$0xff] %v1309_v5 }
 0x4dd   : > { %v1270_v29 = vpop.f32.mrf.mxu0  ;;  %v1299_v43 = vpop.f32.mrf.mxu1 }
 0x4de   : > { %v1310_v48 = vadd.f32 %v1270_v29, %v1244_v47  ;;  %v1311_v33 = vadd.f32 %v1299_v43, %v1245_v7 }
 0x4e0   : > { %1318 = vst [vmem:[#allocation3 + $0x8] sm:$0xff] %v1310_v48 }
 0x4e1   : > { %1319 = vst [vmem:[#allocation3 + $0x18] sm:$0xff] %v1311_v33 }
 0x4e5   : > { %v1273_v3 = vpop.f32.mrf.mxu0  ;;  %v1302_v49 = vpop.f32.mrf.mxu1 }
 0x4e6   : > { %v1312_v21 = vadd.f32 %v1273_v3, %v1246_v26  ;;  %v1313_v52 = vadd.f32 %v1302_v49, %v1247_v31 }
 0x4e8   : > { %1320 = vst [vmem:[#allocation3 + $0x20] sm:$0xff] %v1312_v21 }
 0x4e9   : > { %1321 = vst [vmem:[#allocation3 + $0x38] sm:$0xff] %v1313_v52 }
 0x4ed   : > { %v1276_v16 = vpop.f32.mrf.mxu0  ;;  %v1305_v63 = vpop.f32.mrf.mxu1  ;;  %1327 = sbr.rel (%p1730_p13) target bundleno = 1693 (0x69d), region = 98 }
 0x4ee   : > { %v1314_v23 = vadd.f32 %v1276_v16, %v1248_v51  ;;  %v1315_v13 = vadd.f32 %v1305_v63, %v1249_v35 }
 0x4f0   : > { %1322 = vst [vmem:[#allocation3 + $0x30] sm:$0xff] %v1314_v23 }
 0x4f1   : > { %1323 = vst [vmem:[#allocation3] sm:$0xff] %v1315_v13 }
 0x4f2   : > { %v1336_v54 = vld [vmem:[#allocation4] sm:$0x3]  ;;  %v1979_v8 = vmov 0   ;;  %v1375_v22 = vld [vmem:[%s2689_s7] sm:$0xff]  ;;  %v1376_v20 = vld [vmem:[%s2689_s7 + $0x8] sm:$0xff]  ;;  %vm1521_vm6 = vcmask 7168  }
 0x4f3   : > { %v1337_v36 = vadd.f32 1e-09, %v1336_v54  ;;  %1917 = vset.pattern.permute.xlu0 %v1979_v8  ;;  %1918 = vset.pattern.permute.xlu1 %v1979_v8  ;;  %v1377_v45 = vld [vmem:[%s2689_s7 + $0x10] sm:$0xff]  ;;  %v1378_v40 = vld [vmem:[%s2689_s7 + $0x18] sm:$0xff]  ;;  %v1333_v15 = vld [vmem:[#allocation3 + $0x38] sm:$0xff]  ;;  %vm1526_vm7 = vcmask 15360  }
 0x4f4   : > { %1381 = vperm.xlu0 %1917, %v1375_v22   ;;  %1391 = vperm.xlu1 %1918, %v1377_v45   ;;  %v1332_v37 = vld [vmem:[#allocation3 + $0x20] sm:$0xff]  ;;  %v1330_v34 = vld [vmem:[#allocation3 + $0x8] sm:$0xff]  ;;  %v1331_v39 = vld [vmem:[#allocation3 + $0x18] sm:$0xff] }
 0x4f5   : > { %1919 = vrcp.f32 %v1337_v36  ;;  %v1361_v0 = vld [vmem:[%s2099_s28 + $0x30] sm:$0xff]  ;;  %v1362_v14 = vld [vmem:[%s2099_s28 + $0x38] sm:$0xff]  ;;  %v1359_v41 = vld [vmem:[%s2099_s28 + $0x20] sm:$0xff] }
 0x4f6   : > { %v1328_v56 = vld [vmem:[#allocation3 + $0x28] sm:$0xff]  ;;  %v1360_v62 = vld [vmem:[%s2099_s28 + $0x28] sm:$0xff]  ;;  %v1329_v11 = vld [vmem:[#allocation3 + $0x10] sm:$0xff] }
 0x4f7   : > { %v1334_v60 = vld [vmem:[#allocation3 + $0x30] sm:$0xff]  ;;  %v1357_v9 = vld [vmem:[%s2099_s28 + $0x10] sm:$0xff]  ;;  %v1358_v42 = vld [vmem:[%s2099_s28 + $0x18] sm:$0xff] }
 0x4f8   : > { %v1335_v1 = vld [vmem:[#allocation3] sm:$0xff]  ;;  %v1355_v24 = vld [vmem:[%s2099_s28] sm:$0xff]  ;;  %v1356_v25 = vld [vmem:[%s2099_s28 + $0x8] sm:$0xff] }
 0x4f9   : > { %v1371_v5 = vld [vmem:[%s2688_s6] sm:$0xff]  ;;  %v1373_v47 = vld [vmem:[%s2688_s6 + $0x10] sm:$0xff]  ;;  %v1372_v7 = vld [vmem:[%s2688_s6 + $0x8] sm:$0xff] }
 0x4fa   : > { %v1374_v29 = vld [vmem:[%s2688_s6 + $0x18] sm:$0xff] }
 0x4fb   : > { %v1920_v59 = vpop.eup %1919 }
 0x4fc   : > { %v1339_v18 = vmul.f32 %v1920_v59, %v1337_v36  ;;  %1386 = vperm.xlu0 %1917, %v1376_v20   ;;  %1396 = vperm.xlu1 %1918, %v1378_v40  }
 0x4fe   : > { %v1340_v6 = vsub.f32 2.0, %v1339_v18 }
 0x500   : > { %v1341_v38 = vmul.f32 %v1920_v59, %v1340_v6 }
 0x502   : > { %v1343_v55 = vperm.slane %v1341_v38, 0  ;;  %v1344_v10 = vperm.slane %v1341_v38, 1 }
 0x504   : > { %v1353_v28 = vmul.f32 %v1343_v55, %v1334_v60  ;;  %v1354_v12 = vmul.f32 %v1344_v10, %v1335_v1  ;;  %v1351_v30 = vmul.f32 %v1343_v55, %v1332_v37  ;;  %v1352_v50 = vmul.f32 %v1344_v10, %v1333_v15 }
 0x505   : > { %v1349_v19 = vmul.f32 %v1343_v55, %v1330_v34  ;;  %v1350_v53 = vmul.f32 %v1344_v10, %v1331_v39  ;;  %v1347_v57 = vmul.f32 %v1343_v55, %v1328_v56  ;;  %v1348_v4 = vmul.f32 %v1344_v10, %v1329_v11 }
 0x506   : > { %v1369_v44 = vsub.f32 %v1361_v0, %v1353_v28  ;;  %v1370_v61 = vsub.f32 %v1362_v14, %v1354_v12  ;;  %v1367_v17 = vsub.f32 %v1359_v41, %v1351_v30  ;;  %v1368_v27 = vsub.f32 %v1360_v62, %v1352_v50 }
 0x507   : > { %v1365_v58 = vsub.f32 %v1357_v9, %v1349_v19  ;;  %v1366_v46 = vsub.f32 %v1358_v42, %v1350_v53  ;;  %v1363_v2 = vsub.f32 %v1355_v24, %v1347_v57  ;;  %v1364_v32 = vsub.f32 %v1356_v25, %v1348_v4 }
 0x508   : > { %1423 = vmatpush.msra.mxu0 %v1369_v44  ;;  %1750 = vmatpush.msra.mxu2 %v1369_v44 }
 0x509   : > { %1452 = vmatpush.msra.mxu1 %v1370_v61  ;;  %1754 = vmatpush.msra.mxu3 %v1370_v61 }
 0x50a   : > { %1424 = vmatpush.msra.mxu0 %v1367_v17  ;;  %1751 = vmatpush.msra.mxu2 %v1367_v17 }
 0x50b   : > { %1453 = vmatpush.msra.mxu1 %v1368_v27  ;;  %1755 = vmatpush.msra.mxu3 %v1368_v27 }
 0x50c   : > { %1425 = vmatpush.msra.mxu0 %v1365_v58  ;;  %1752 = vmatpush.msra.mxu2 %v1365_v58 }
 0x50d   : > { %1454 = vmatpush.msra.mxu1 %v1366_v46  ;;  %1756 = vmatpush.msra.mxu3 %v1366_v46 }
 0x50e   : > { %1426 = vmatpush.msra.mxu0 %v1363_v2  ;;  %1753 = vmatpush.msra.mxu2 %v1363_v2 }
 0x50f   : > { %1455 = vmatpush.msra.mxu1 %v1364_v32  ;;  %1757 = vmatpush.msra.mxu3 %v1364_v32 }
 0x510   : > { %1731 = vmatmul.msk.f32.vlgmr.msra.gmra.mxu0 %vm545_vm2, %v1371_v5  ;;  %1733 = vmatmul.msk.f32.vlgmr.msra.gmra.mxu2 %vm545_vm2, %v1373_v47 }
 0x511   : > { %1735 = vmatmul.msk.f32.vlgmr.msra.gmra.mxu1 %vm545_vm2, %v1371_v5  ;;  %1737 = vmatmul.msk.f32.vlgmr.msra.gmra.mxu3 %vm545_vm2, %v1373_v47 }
 0x518   : > { %1732 = vmatmul.msk.f32.gmra.mxu0 %vm545_vm2, %v1372_v7  ;;  %1734 = vmatmul.msk.f32.gmra.mxu2 %vm545_vm2, %v1374_v29 }
 0x519   : > { %1736 = vmatmul.msk.f32.gmra.mxu1 %vm545_vm2, %v1372_v7  ;;  %1738 = vmatmul.msk.f32.gmra.mxu3 %vm545_vm2, %v1374_v29 }
 0x566   : > { %v1382_v43 = vpop.permute.xlu0 %1381  ;;  %v1392_v3 = vpop.permute.xlu1 %1391 }
 0x56e   : > { %v1387_v35 = vpop.permute.xlu0 %1386  ;;  %v1397_v22 = vpop.permute.xlu1 %1396 }
 0x58d   : > { %v1428_v48 = vpop.f32.mrf.mxu0 }
 0x58e   : > { %v1429_v33 = vadd.f32 %v1428_v48, %v1382_v43  ;;  %v1457_v26 = vpop.f32.mrf.mxu1 }
 0x58f   : > { %v1458_v31 = vadd.f32 %v1457_v26, %v1382_v43 }
 0x590   : > { %1469 = vst [vmem:[%s2104_s17] sm:$0xff] %v1429_v33 }
 0x591   : > { %1470 = vst [vmem:[%s2104_s17 + $0x8] sm:$0xff] %v1458_v31  ;;  %v1477_v49 = vadd.f32 %v1458_v31, %v1429_v33 }
 0x593   : > { %1478 = vadd.xlane.f32.xlu2 %v1477_v49  ;;  %v1434_v21 = vpop.f32.mrf.mxu2 }
 0x594   : > { %v1435_v52 = vadd.f32 %v1434_v21, %v1392_v3  ;;  %v1463_v51 = vpop.f32.mrf.mxu3 }
 0x595   : > { %v1464_v16 = vadd.f32 %v1463_v51, %v1392_v3  ;;  %v1431_v63 = vpop.f32.mrf.mxu0 }
 0x596   : > { %1473 = vst [vmem:[%s2104_s17 + $0x20] sm:$0xff] %v1435_v52  ;;  %v1432_v23 = vadd.f32 %v1431_v63, %v1387_v35  ;;  %v1460_v13 = vpop.f32.mrf.mxu1 }
 0x597   : > { %1474 = vst [vmem:[%s2104_s17 + $0x28] sm:$0xff] %v1464_v16  ;;  %v1461_v54 = vadd.f32 %v1460_v13, %v1387_v35  ;;  %v1483_v36 = vadd.f32 %v1464_v16, %v1435_v52 }
 0x598   : > { %1471 = vst [vmem:[%s2104_s17 + $0x10] sm:$0xff] %v1432_v23 }
 0x599   : > { %1472 = vst [vmem:[%s2104_s17 + $0x18] sm:$0xff] %v1461_v54  ;;  %1484 = vadd.xlane.f32.xlu0 %v1483_v36  ;;  %v1480_v8 = vadd.f32 %v1461_v54, %v1432_v23 }
 0x59b   : > { %1481 = vadd.xlane.f32.xlu2 %v1480_v8  ;;  %v1437_v45 = vpop.f32.mrf.mxu2 }
 0x59c   : > { %v1438_v59 = vadd.f32 %v1437_v45, %v1397_v22  ;;  %v1466_v18 = vpop.f32.mrf.mxu3 }
 0x59d   : > { %v1467_v6 = vadd.f32 %v1466_v18, %v1397_v22 }
 0x59e   : > { %1475 = vst [vmem:[%s2104_s17 + $0x30] sm:$0xff] %v1438_v59 }
 0x59f   : > { %1476 = vst [vmem:[%s2104_s17 + $0x38] sm:$0xff] %v1467_v6  ;;  %v1486_v20 = vadd.f32 %v1467_v6, %v1438_v59 }
 0x5a1   : > { %1487 = vadd.xlane.f32.xlu1 %v1486_v20 }
 0x606   : > { %v1479_v40 = vpop.xlane.xlu2 %1478 }
 0x607   : > { %v1489_v60 = vmul.f32 0.00390625, %v1479_v40 }
 0x609   : > { %v1493_v38 = vsub.f32 %v1429_v33, %v1489_v60  ;;  %v1494_v1 = vsub.f32 %v1458_v31, %v1489_v60 }
 0x60b   : > { %v1501_v37 = vmul.f32 %v1493_v38, %v1493_v38  ;;  %v1502_v15 = vmul.f32 %v1494_v1, %v1494_v1 }
 0x60c   : > { %v1485_v55 = vpop.xlane.xlu0 %1484 }
 0x60d   : > { %v1491_v0 = vmul.f32 0.00390625, %v1485_v55  ;;  %v1509_v10 = vadd.f32 %v1502_v15, %v1501_v37 }
 0x60e   : > { %v1482_v34 = vpop.xlane.xlu2 %1481 }
 0x60f   : > { %1510 = vadd.xlane.f32.xlu2 %v1509_v10  ;;  %v1497_v39 = vsub.f32 %v1435_v52, %v1491_v0  ;;  %v1498_v14 = vsub.f32 %v1464_v16, %v1491_v0  ;;  %v1490_v41 = vmul.f32 0.00390625, %v1482_v34 }
 0x611   : > { %v1505_v56 = vmul.f32 %v1497_v39, %v1497_v39  ;;  %v1506_v28 = vmul.f32 %v1498_v14, %v1498_v14  ;;  %v1495_v30 = vsub.f32 %v1432_v23, %v1490_v41  ;;  %v1496_v50 = vsub.f32 %v1461_v54, %v1490_v41 }
 0x613   : > { %v1515_v12 = vadd.f32 %v1506_v28, %v1505_v56  ;;  %v1503_v19 = vmul.f32 %v1495_v30, %v1495_v30  ;;  %v1504_v9 = vmul.f32 %v1496_v50, %v1496_v50 }
 0x614   : > { %v1488_v62 = vpop.xlane.xlu1 %1487 }
 0x615   : > { %v1492_v11 = vmul.f32 0.00390625, %v1488_v62  ;;  %v1512_v53 = vadd.f32 %v1504_v9, %v1503_v19 }
 0x617   : > { %1516 = vadd.xlane.f32.xlu2 %v1515_v12  ;;  %v1499_v44 = vsub.f32 %v1438_v59, %v1492_v11  ;;  %v1500_v61 = vsub.f32 %v1467_v6, %v1492_v11 }
 0x619   : > { %v1507_v17 = vmul.f32 %v1499_v44, %v1499_v44  ;;  %v1508_v42 = vmul.f32 %v1500_v61, %v1500_v61 }
 0x61b   : > { %v1518_v57 = vadd.f32 %v1508_v42, %v1507_v17 }
 0x61f   : > { %1513 = vadd.xlane.f32.xlu2 %v1512_v53 }
 0x627   : > { %1519 = vadd.xlane.f32.xlu2 %v1518_v57 }
 0x682   : > { %v1511_v27 = vpop.xlane.xlu2 %1510 }
 0x683   : > { %v1522_v24 = vsel %vm1521_vm6, %v1489_v60, %v1511_v27 }
 0x684   : > { %1527 = vst.msk [vmem:[%s2109_s14] sm:$0xff] %vm1526_vm7, %v1522_v24 }
 0x68a   : > { %v1517_v4 = vpop.xlane.xlu2 %1516 }
 0x68b   : > { %v1524_v58 = vsel %vm1521_vm6, %v1491_v0, %v1517_v4 }
 0x68c   : > { %1529 = vst.msk [vmem:[%s2109_s14 + $0x10] sm:$0xff] %vm1526_vm7, %v1524_v58 }
 0x692   : > { %v1514_v25 = vpop.xlane.xlu2 %1513 }
 0x693   : > { %v1523_v46 = vsel %vm1521_vm6, %v1490_v41, %v1514_v25 }
 0x694   : > { %1528 = vst.msk [vmem:[%s2109_s14 + $0x8] sm:$0xff] %vm1526_vm7, %v1523_v46 }
 0x69a   : > { %v1520_v2 = vpop.xlane.xlu2 %1519 }
 0x69b   : > { %v1525_v32 = vsel %vm1521_vm6, %v1492_v11, %v1520_v2 }
 0x69c   : > { %1530 = vst.msk [vmem:[%s2109_s14 + $0x18] sm:$0xff] %vm1526_vm7, %v1525_v32 }
 0x69d PF: > { %s20_s15 = sadd.s32 1, %s1975_s15   ;;  %s2729_s17 = sld [smem:[#allocation10_spill]] }
 0x69e   : > { %p17_p0 = scmp.ge.s32.totalorder %s20_s15, 6   ;;  %s2730_s11 = sld [smem:[#allocation6_spill]] }
 0x69f   : > { %s2731_s12 = sld [smem:[#allocation7_spill]]  ;;  %s2734_s30 = smov %s1955_s10 }
 0x6a0   : > { %s2732_s13 = sld [smem:[#allocation8_spill]]  ;;  %19 = sbr.rel (!%p17_p0) target bundleno = 6 (0x6), region = 151 }
 0x6a1   : > { %s2733_s14 = sld [smem:[#allocation9_spill]] }
 0x6a3   : > { %s2735_s10 = smov %s2729_s17 }

</bundles_post_ra>
